<compile_context>
chip_gen: v5e
topology: v5e:2x2
jax: 0.10.0
libtpu: 0.0.40
codegen_flags: <defaults>
</compile_context>

<pallas_src>
import functools

import jax
import jax.numpy as jnp
import numpy as np
from jax.experimental import pallas as pl
from jax.experimental.pallas import tpu as pltpu


# ---------------------------------------------------------------------------
# The single fused kernel
# ---------------------------------------------------------------------------
def _tree_fused_kernel(xpp_ref, mask_ref,
                       w11_ref, b11_ref, w12_ref, b12_ref,
                       w21_ref, b21_ref, w22_ref, b22_ref,
                       wpj_ref, bpj_ref,
                       wr2_ref, wr1_ref, wrb_ref, br_ref,
                       o_ref, *, n, ho, wo):
    f32 = jnp.float32
    P = n * ho * wo                      # pixels on the lane axis (= 128 here)

    # Preload the 9 per-tap validity masks once (hoisted out of all loops).
    masks = [mask_ref[pl.ds(t, 1), :] for t in range(9)]          # each (1, P)

    def shift(img, dh, dw):
        """img[:, p] -> img[:, p + dh*wo + dw], zero outside the image.

        Activations are channel-major (C, P), so a spatial (dh, dw) tap is a
        lane rotation (XLU, nearly free) followed by a VPU multiply with the
        precomputed validity mask.  Any wraparound / cross-image lanes are
        exactly the masked-out ones, so the rotation is safe.
        """
        if dh == 0 and dw == 0:
            return img
        off = dh * wo + dw
        rolled = pltpu.roll(img, (-off) % P, 1)
        return rolled * masks[(dh + 1) * 3 + (dw + 1)]

    def conv3x3_s1(img, w_ref, b_ref):
        # 3x3 / stride-1 / pad-1 conv as 9 accumulated matmuls (BN folded).
        acc = jnp.dot(w_ref[4], img, preferred_element_type=f32)   # centre tap
        for kh in range(3):
            for kw in range(3):
                if (kh, kw) == (1, 1):
                    continue
                acc = acc + jnp.dot(w_ref[kh * 3 + kw],
                                    shift(img, kh - 1, kw - 1),
                                    preferred_element_type=f32)
        return acc + b_ref[...]

    # --- parity images of the full-res input: x[:, :, a::2, b::2] ----------
    p00, p01, p10, p11 = xpp_ref[0], xpp_ref[1], xpp_ref[2], xpp_ref[3]

    # --- downsample: fused 2x2 / stride-2 max-pool ---------------------------
    bottom = jnp.maximum(jnp.maximum(p00, p01), jnp.maximum(p10, p11))

    # --- project: 1x1 conv + BN (no activation) ------------------------------
    residual = (jnp.dot(wpj_ref[...], bottom, preferred_element_type=f32)
                + bpj_ref[...])

    # --- tree1.conv1: 3x3 / stride-2 conv, expressed over the parity images --
    # input row 2i+kh-1: kh=0 -> odd rows @ i-1, kh=1 -> even @ i, kh=2 -> odd @ i
    parity = (p00, p01, p10, p11)
    acc = None
    for kh in range(3):
        rp, dr = ((1, -1), (0, 0), (1, 0))[kh]
        for kw in range(3):
            cp, dc = ((1, -1), (0, 0), (1, 0))[kw]
            part = jnp.dot(w11_ref[kh * 3 + kw],
                           shift(parity[rp * 2 + cp], dr, dc),
                           preferred_element_type=f32)
            acc = part if acc is None else acc + part
    t1 = jnp.maximum(acc + b11_ref[...], 0.0)

    # --- tree1.conv2 + projected residual + ReLU -> x1 -----------------------
    x1 = jnp.maximum(conv3x3_s1(t1, w12_ref, b12_ref) + residual, 0.0)

    # --- tree2 (BasicBlock, stride 1, identity = x1) -------------------------
    t2 = jnp.maximum(conv3x3_s1(x1, w21_ref, b21_ref), 0.0)
    x2 = jnp.maximum(conv3x3_s1(t2, w22_ref, b22_ref) + x1, 0.0)

    # --- Root: 1x1 conv over cat([x2, x1, bottom]) as 3 accumulated matmuls --
    out = (jnp.dot(wr2_ref[...], x2, preferred_element_type=f32)
           + jnp.dot(wr1_ref[...], x1, preferred_element_type=f32)
           + jnp.dot(wrb_ref[...], bottom, preferred_element_type=f32)
           + br_ref[...])
    o_ref[...] = jnp.maximum(out, 0.0)


# ---------------------------------------------------------------------------
# Host-side glue: layout plumbing, BN folding, pallas_call wrapper
# ---------------------------------------------------------------------------
def _shift_valid_masks(n, ho, wo):
    """(9, P) f32; mask[(dh+1)*3+(dw+1), p] = 1 iff pixel p has a valid
    (dh, dw)-shifted source inside the same image."""
    P = n * ho * wo
    pix = np.arange(P)
    i = (pix // wo) % ho
    j = pix % wo
    m = np.zeros((9, P), np.float32)
    for dh in (-1, 0, 1):
        for dw in (-1, 0, 1):
            ok = (i + dh >= 0) & (i + dh < ho) & (j + dw >= 0) & (j + dw < wo)
            m[(dh + 1) * 3 + (dw + 1)] = ok
    return jnp.asarray(m)


def _fold3x3(w_hwio, scale, beta):
    """(3,3,cin,cout) HWIO conv + BN(scale,beta) -> ((9,cout,cin), (cout,1))."""
    wf = w_hwio * scale[None, None, None, :]
    w = jnp.transpose(wf.reshape(9, wf.shape[2], wf.shape[3]), (0, 2, 1))
    return w, beta.reshape(-1, 1)


def _fold1x1(w_hwio, scale, beta):
    """(1,1,cin,cout) HWIO conv + BN(scale,beta) -> ((cout,cin), (cout,1))."""
    w = (w_hwio[0, 0] * scale[None, :]).T
    return w, beta.reshape(-1, 1)


def tree_forward(x_nchw, params):
    """Tree(levels=1, BasicBlock, cin->cout, stride=2, level_root=True)."""
    N, Cin, H, W = x_nchw.shape
    assert H % 2 == 0 and W % 2 == 0
    Ho, Wo = H // 2, W // 2
    P = N * Ho * Wo
    Cout = params["root"]["b"].shape[0]

    # Boundary layout plumbing: even/odd parity split + channel-major flatten.
    # x_pp[a*2+b, c, n*Ho*Wo + i*Wo + j] = x[n, c, 2i+a, 2j+b]
    x_pp = jnp.transpose(
        x_nchw.reshape(N, Cin, Ho, 2, Wo, 2), (3, 5, 1, 0, 2, 4)
    ).reshape(4, Cin, P)
    masks = _shift_valid_masks(N, Ho, Wo)

    # Fold inference-mode BN scale into the conv weights (trace-time).
    t1, t2, rt, pj = params["tree1"], params["tree2"], params["root"], params["proj"]
    w11, b11 = _fold3x3(t1["w1"], t1["s1"], t1["b1"])
    w12, b12 = _fold3x3(t1["w2"], t1["s2"], t1["b2"])
    w21, b21 = _fold3x3(t2["w1"], t2["s1"], t2["b1"])
    w22, b22 = _fold3x3(t2["w2"], t2["s2"], t2["b2"])
    wpj, bpj = _fold1x1(pj["w"], pj["s"], pj["b"])
    wr, br = _fold1x1(rt["w"], rt["s"], rt["b"])
    wr2, wr1, wrb = wr[:, :Cout], wr[:, Cout:2 * Cout], wr[:, 2 * Cout:]

    vmem = pl.BlockSpec(memory_space=pltpu.MemorySpace.VMEM)
    out_cm = pl.pallas_call(
        functools.partial(_tree_fused_kernel, n=N, ho=Ho, wo=Wo),
        out_shape=jax.ShapeDtypeStruct((Cout, P), jnp.float32),
        in_specs=[vmem] * 16,
        out_specs=vmem,
    )(x_pp, masks, w11, b11, w12, b12, w21, b21, w22, b22,
      wpj, bpj, wr2, wr1, wrb, br)

    # (Cout, N*Ho*Wo) -> NCHW
    return jnp.transpose(out_cm.reshape(Cout, N, Ho, Wo), (1, 0, 2, 3))


# ---------------------------------------------------------------------------
# Pure-JAX/XLA reference (validation only)
# ---------------------------------------------------------------------------
def _reference_forward(x_nchw, params):
    def conv(x, w_hwio, scale, beta, stride, pad):
        w_oihw = jnp.transpose(w_hwio, (3, 2, 0, 1))
        y = jax.lax.conv_general_dilated(
            x, w_oihw, (stride, stride), [(pad, pad), (pad, pad)],
            dimension_numbers=("NCHW", "OIHW", "NCHW"),
            precision=jax.lax.Precision.HIGHEST)
        return y * scale[None, :, None, None] + beta[None, :, None, None]

    def block(x, p, stride, identity):
        y = jnp.maximum(conv(x, p["w1"], p["s1"], p["b1"], stride, 1), 0.0)
        y = conv(y, p["w2"], p["s2"], p["b2"], 1, 1) + identity
        return jnp.maximum(y, 0.0)

    bottom = jax.lax.reduce_window(x_nchw, -jnp.inf, jax.lax.max,
                                   (1, 1, 2, 2), (1, 1, 2, 2), "VALID")
    residual = conv(bottom, params["proj"]["w"], params["proj"]["s"],
                    params["proj"]["b"], 1, 0)
    x1 = block(x_nchw, params["tree1"], 2, residual)
    x2 = block(x1, params["tree2"], 1, x1)
    cat = jnp.concatenate([x2, x1, bottom], axis=1)
    out = conv(cat, params["root"]["w"], params["root"]["s"],
               params["root"]["b"], 1, 0)
    return jnp.maximum(out, 0.0)


# ---------------------------------------------------------------------------
# Deterministic parameter init (HWIO conv weights + inference-mode BN)
# ---------------------------------------------------------------------------
def _init_conv(key, kh, kw, cin, cout):
    return 0.1 * jax.random.normal(key, (kh, kw, cin, cout), jnp.float32)


def _init_bn(key, c, eps=1e-5):
    k1, k2 = jax.random.split(key)
    gamma = 1.0 + 0.1 * jax.random.normal(k1, (c,), jnp.float32)
    beta = 0.1 * jax.random.normal(k2, (c,), jnp.float32)
    scale = gamma / jnp.sqrt(1.0 + eps)   # running_mean = 0, running_var = 1
    return scale, beta


def init_tree_params(key, cin=4, cout=8):
    keys = jax.random.split(key, 12)
    root_dim = 2 * cout + cin            # root_dim=0 -> 2*out; level_root -> +in
    p = {}
    s1, b1 = _init_bn(keys[1], cout)
    s2, b2 = _init_bn(keys[3], cout)
    p["tree1"] = {"w1": _init_conv(keys[0], 3, 3, cin, cout), "s1": s1, "b1": b1,
                  "w2": _init_conv(keys[2], 3, 3, cout, cout), "s2": s2, "b2": b2}
    s1, b1 = _init_bn(keys[5], cout)
    s2, b2 = _init_bn(keys[7], cout)
    p["tree2"] = {"w1": _init_conv(keys[4], 3, 3, cout, cout), "s1": s1, "b1": b1,
                  "w2": _init_conv(keys[6], 3, 3, cout, cout), "s2": s2, "b2": b2}
    rs, rb = _init_bn(keys[9], cout)
    p["root"] = {"w": _init_conv(keys[8], 1, 1, root_dim, cout), "s": rs, "b": rb}
    ps, pb = _init_bn(keys[11], cout)
    p["proj"] = {"w": _init_conv(keys[10], 1, 1, cin, cout), "s": ps, "b": pb}
    return p


# ---------------------------------------------------------------------------
if __name__ == "__main__":
    key = jax.random.PRNGKey(0)
    k_x, k_p = jax.random.split(key)

    N, C, H, W = 2, 4, 16, 16                         # PyTorch NCHW input shape
    x_nchw = jax.random.normal(k_x, (N, C, H, W), jnp.float32)
    params = init_tree_params(k_p, cin=C, cout=8)

    out_nchw = jax.jit(tree_forward)(x_nchw, params)  # (2, 8, 8, 8) NCHW
    jax.block_until_ready(out_nchw)

    assert out_nchw.shape == (2, 8, 8, 8)
    assert bool(jnp.all(out_nchw >= 0.0))             # final ReLU

    ref = _reference_forward(x_nchw, params)
    rel_err = float(jnp.max(jnp.abs(out_nchw - ref))
                    / (jnp.max(jnp.abs(ref)) + 1e-6))
    assert rel_err < 2e-2, f"mismatch vs pure-JAX reference: {rel_err:.3e}"

    print("KERNEL_OK")
</pallas_src>

<mosaic_0001>
module attributes {stable_mosaic.version = 11 : i64} {
  func.func @_tree_fused_kernel(%arg0: memref<4x4x128xf32, #tpu.memory_space<vmem>>, %arg1: memref<9x128xf32, #tpu.memory_space<vmem>>, %arg2: memref<9x8x4xf32, #tpu.memory_space<vmem>>, %arg3: memref<8x1xf32, #tpu.memory_space<vmem>>, %arg4: memref<9x8x8xf32, #tpu.memory_space<vmem>>, %arg5: memref<8x1xf32, #tpu.memory_space<vmem>>, %arg6: memref<9x8x8xf32, #tpu.memory_space<vmem>>, %arg7: memref<8x1xf32, #tpu.memory_space<vmem>>, %arg8: memref<9x8x8xf32, #tpu.memory_space<vmem>>, %arg9: memref<8x1xf32, #tpu.memory_space<vmem>>, %arg10: memref<8x4xf32, #tpu.memory_space<vmem>>, %arg11: memref<8x1xf32, #tpu.memory_space<vmem>>, %arg12: memref<8x8xf32, #tpu.memory_space<vmem>>, %arg13: memref<8x8xf32, #tpu.memory_space<vmem>>, %arg14: memref<8x4xf32, #tpu.memory_space<vmem>>, %arg15: memref<8x1xf32, #tpu.memory_space<vmem>>, %arg16: memref<8x128xf32, #tpu.memory_space<vmem>>) attributes {dimension_semantics = [], scalar_prefetch = 0 : i64, scratch_operands = 0 : i64, tpu.core_type = #tpu.core_type<tc>} {
    %c0 = arith.constant 0 : index
    %c0_0 = arith.constant 0 : index
    %0 = vector.load %arg1[%c0, %c0_0] : memref<9x128xf32, #tpu.memory_space<vmem>>, vector<1x128xf32>
    %c1 = arith.constant 1 : index
    %c0_1 = arith.constant 0 : index
    %1 = vector.load %arg1[%c1, %c0_1] : memref<9x128xf32, #tpu.memory_space<vmem>>, vector<1x128xf32>
    %c2 = arith.constant 2 : index
    %c0_2 = arith.constant 0 : index
    %2 = vector.load %arg1[%c2, %c0_2] : memref<9x128xf32, #tpu.memory_space<vmem>>, vector<1x128xf32>
    %c3 = arith.constant 3 : index
    %c0_3 = arith.constant 0 : index
    %3 = vector.load %arg1[%c3, %c0_3] : memref<9x128xf32, #tpu.memory_space<vmem>>, vector<1x128xf32>
    %c5 = arith.constant 5 : index
    %c0_4 = arith.constant 0 : index
    %4 = vector.load %arg1[%c5, %c0_4] : memref<9x128xf32, #tpu.memory_space<vmem>>, vector<1x128xf32>
    %c6 = arith.constant 6 : index
    %c0_5 = arith.constant 0 : index
    %5 = vector.load %arg1[%c6, %c0_5] : memref<9x128xf32, #tpu.memory_space<vmem>>, vector<1x128xf32>
    %c7 = arith.constant 7 : index
    %c0_6 = arith.constant 0 : index
    %6 = vector.load %arg1[%c7, %c0_6] : memref<9x128xf32, #tpu.memory_space<vmem>>, vector<1x128xf32>
    %c8 = arith.constant 8 : index
    %c0_7 = arith.constant 0 : index
    %7 = vector.load %arg1[%c8, %c0_7] : memref<9x128xf32, #tpu.memory_space<vmem>>, vector<1x128xf32>
    %c0_8 = arith.constant 0 : index
    %c0_9 = arith.constant 0 : index
    %c0_10 = arith.constant 0 : index
    %8 = vector.load %arg0[%c0_8, %c0_9, %c0_10] : memref<4x4x128xf32, #tpu.memory_space<vmem>>, vector<1x4x128xf32>
    %9 = vector.shape_cast %8 : vector<1x4x128xf32> to vector<4x128xf32>
    %c1_11 = arith.constant 1 : index
    %c0_12 = arith.constant 0 : index
    %c0_13 = arith.constant 0 : index
    %10 = vector.load %arg0[%c1_11, %c0_12, %c0_13] : memref<4x4x128xf32, #tpu.memory_space<vmem>>, vector<1x4x128xf32>
    %11 = vector.shape_cast %10 : vector<1x4x128xf32> to vector<4x128xf32>
    %c2_14 = arith.constant 2 : index
    %c0_15 = arith.constant 0 : index
    %c0_16 = arith.constant 0 : index
    %12 = vector.load %arg0[%c2_14, %c0_15, %c0_16] : memref<4x4x128xf32, #tpu.memory_space<vmem>>, vector<1x4x128xf32>
    %13 = vector.shape_cast %12 : vector<1x4x128xf32> to vector<4x128xf32>
    %c3_17 = arith.constant 3 : index
    %c0_18 = arith.constant 0 : index
    %c0_19 = arith.constant 0 : index
    %14 = vector.load %arg0[%c3_17, %c0_18, %c0_19] : memref<4x4x128xf32, #tpu.memory_space<vmem>>, vector<1x4x128xf32>
    %15 = vector.shape_cast %14 : vector<1x4x128xf32> to vector<4x128xf32>
    %16 = arith.maximumf %9, %11 : vector<4x128xf32>
    %17 = arith.maximumf %13, %15 : vector<4x128xf32>
    %18 = arith.maximumf %16, %17 : vector<4x128xf32>
    %c0_20 = arith.constant 0 : index
    %c0_21 = arith.constant 0 : index
    %19 = vector.load %arg10[%c0_20, %c0_21] : memref<8x4xf32, #tpu.memory_space<vmem>>, vector<8x4xf32>
    %cst = arith.constant dense<0.000000e+00> : vector<8x128xf32>
    %20 = tpu.matmul %19, %18, %cst {dimension_numbers = #tpu.dot_dimension_numbers<[1], [0], [0], [1], [0, 0, 1, 1], [], []>} : vector<8x4xf32>, vector<4x128xf32>, vector<8x128xf32> -> vector<8x128xf32>
    %c0_22 = arith.constant 0 : index
    %c0_23 = arith.constant 0 : index
    %21 = vector.load %arg11[%c0_22, %c0_23] : memref<8x1xf32, #tpu.memory_space<vmem>>, vector<8x1xf32>
    %22 = vector.broadcast %21 : vector<8x1xf32> to vector<8x128xf32>
    %23 = arith.addf %20, %22 : vector<8x128xf32>
    %c0_24 = arith.constant 0 : index
    %c0_25 = arith.constant 0 : index
    %c0_26 = arith.constant 0 : index
    %24 = vector.load %arg2[%c0_24, %c0_25, %c0_26] : memref<9x8x4xf32, #tpu.memory_space<vmem>>, vector<1x8x4xf32>
    %25 = vector.shape_cast %24 : vector<1x8x4xf32> to vector<8x4xf32>
    %c9_i32 = arith.constant 9 : i32
    %26 = tpu.dynamic_rotate %15 by %c9_i32 dim 1 : vector<4x128xf32>, i32 -> vector<4x128xf32>
    %27 = vector.broadcast %0 : vector<1x128xf32> to vector<4x128xf32>
    %28 = arith.mulf %26, %27 : vector<4x128xf32>
    %cst_27 = arith.constant dense<0.000000e+00> : vector<8x128xf32>
    %29 = tpu.matmul %25, %28, %cst_27 {dimension_numbers = #tpu.dot_dimension_numbers<[1], [0], [0], [1], [0, 0, 1, 1], [], []>} : vector<8x4xf32>, vector<4x128xf32>, vector<8x128xf32> -> vector<8x128xf32>
    %c1_28 = arith.constant 1 : index
    %c0_29 = arith.constant 0 : index
    %c0_30 = arith.constant 0 : index
    %30 = vector.load %arg2[%c1_28, %c0_29, %c0_30] : memref<9x8x4xf32, #tpu.memory_space<vmem>>, vector<1x8x4xf32>
    %31 = vector.shape_cast %30 : vector<1x8x4xf32> to vector<8x4xf32>
    %c8_i32 = arith.constant 8 : i32
    %32 = tpu.dynamic_rotate %13 by %c8_i32 dim 1 : vector<4x128xf32>, i32 -> vector<4x128xf32>
    %33 = vector.broadcast %1 : vector<1x128xf32> to vector<4x128xf32>
    %34 = arith.mulf %32, %33 : vector<4x128xf32>
    %cst_31 = arith.constant dense<0.000000e+00> : vector<8x128xf32>
    %35 = tpu.matmul %31, %34, %cst_31 {dimension_numbers = #tpu.dot_dimension_numbers<[1], [0], [0], [1], [0, 0, 1, 1], [], []>} : vector<8x4xf32>, vector<4x128xf32>, vector<8x128xf32> -> vector<8x128xf32>
    %36 = arith.addf %29, %35 : vector<8x128xf32>
    %c2_32 = arith.constant 2 : index
    %c0_33 = arith.constant 0 : index
    %c0_34 = arith.constant 0 : index
    %37 = vector.load %arg2[%c2_32, %c0_33, %c0_34] : memref<9x8x4xf32, #tpu.memory_space<vmem>>, vector<1x8x4xf32>
    %38 = vector.shape_cast %37 : vector<1x8x4xf32> to vector<8x4xf32>
    %c8_i32_35 = arith.constant 8 : i32
    %39 = tpu.dynamic_rotate %15 by %c8_i32_35 dim 1 : vector<4x128xf32>, i32 -> vector<4x128xf32>
    %40 = vector.broadcast %1 : vector<1x128xf32> to vector<4x128xf32>
    %41 = arith.mulf %39, %40 : vector<4x128xf32>
    %cst_36 = arith.constant dense<0.000000e+00> : vector<8x128xf32>
    %42 = tpu.matmul %38, %41, %cst_36 {dimension_numbers = #tpu.dot_dimension_numbers<[1], [0], [0], [1], [0, 0, 1, 1], [], []>} : vector<8x4xf32>, vector<4x128xf32>, vector<8x128xf32> -> vector<8x128xf32>
    %43 = arith.addf %36, %42 : vector<8x128xf32>
    %c3_37 = arith.constant 3 : index
    %c0_38 = arith.constant 0 : index
    %c0_39 = arith.constant 0 : index
    %44 = vector.load %arg2[%c3_37, %c0_38, %c0_39] : memref<9x8x4xf32, #tpu.memory_space<vmem>>, vector<1x8x4xf32>
    %45 = vector.shape_cast %44 : vector<1x8x4xf32> to vector<8x4xf32>
    %c1_i32 = arith.constant 1 : i32
    %46 = tpu.dynamic_rotate %11 by %c1_i32 dim 1 : vector<4x128xf32>, i32 -> vector<4x128xf32>
    %47 = vector.broadcast %3 : vector<1x128xf32> to vector<4x128xf32>
    %48 = arith.mulf %46, %47 : vector<4x128xf32>
    %cst_40 = arith.constant dense<0.000000e+00> : vector<8x128xf32>
    %49 = tpu.matmul %45, %48, %cst_40 {dimension_numbers = #tpu.dot_dimension_numbers<[1], [0], [0], [1], [0, 0, 1, 1], [], []>} : vector<8x4xf32>, vector<4x128xf32>, vector<8x128xf32> -> vector<8x128xf32>
    %50 = arith.addf %43, %49 : vector<8x128xf32>
    %c4 = arith.constant 4 : index
    %c0_41 = arith.constant 0 : index
    %c0_42 = arith.constant 0 : index
    %51 = vector.load %arg2[%c4, %c0_41, %c0_42] : memref<9x8x4xf32, #tpu.memory_space<vmem>>, vector<1x8x4xf32>
    %52 = vector.shape_cast %51 : vector<1x8x4xf32> to vector<8x4xf32>
    %cst_43 = arith.constant dense<0.000000e+00> : vector<8x128xf32>
    %53 = tpu.matmul %52, %9, %cst_43 {dimension_numbers = #tpu.dot_dimension_numbers<[1], [0], [0], [1], [0, 0, 1, 1], [], []>} : vector<8x4xf32>, vector<4x128xf32>, vector<8x128xf32> -> vector<8x128xf32>
    %54 = arith.addf %50, %53 : vector<8x128xf32>
    %c5_44 = arith.constant 5 : index
    %c0_45 = arith.constant 0 : index
    %c0_46 = arith.constant 0 : index
    %55 = vector.load %arg2[%c5_44, %c0_45, %c0_46] : memref<9x8x4xf32, #tpu.memory_space<vmem>>, vector<1x8x4xf32>
    %56 = vector.shape_cast %55 : vector<1x8x4xf32> to vector<8x4xf32>
    %cst_47 = arith.constant dense<0.000000e+00> : vector<8x128xf32>
    %57 = tpu.matmul %56, %11, %cst_47 {dimension_numbers = #tpu.dot_dimension_numbers<[1], [0], [0], [1], [0, 0, 1, 1], [], []>} : vector<8x4xf32>, vector<4x128xf32>, vector<8x128xf32> -> vector<8x128xf32>
    %58 = arith.addf %54, %57 : vector<8x128xf32>
    %c6_48 = arith.constant 6 : index
    %c0_49 = arith.constant 0 : index
    %c0_50 = arith.constant 0 : index
    %59 = vector.load %arg2[%c6_48, %c0_49, %c0_50] : memref<9x8x4xf32, #tpu.memory_space<vmem>>, vector<1x8x4xf32>
    %60 = vector.shape_cast %59 : vector<1x8x4xf32> to vector<8x4xf32>
    %c1_i32_51 = arith.constant 1 : i32
    %61 = tpu.dynamic_rotate %15 by %c1_i32_51 dim 1 : vector<4x128xf32>, i32 -> vector<4x128xf32>
    %62 = vector.broadcast %3 : vector<1x128xf32> to vector<4x128xf32>
    %63 = arith.mulf %61, %62 : vector<4x128xf32>
    %cst_52 = arith.constant dense<0.000000e+00> : vector<8x128xf32>
    %64 = tpu.matmul %60, %63, %cst_52 {dimension_numbers = #tpu.dot_dimension_numbers<[1], [0], [0], [1], [0, 0, 1, 1], [], []>} : vector<8x4xf32>, vector<4x128xf32>, vector<8x128xf32> -> vector<8x128xf32>
    %65 = arith.addf %58, %64 : vector<8x128xf32>
    %c7_53 = arith.constant 7 : index
    %c0_54 = arith.constant 0 : index
    %c0_55 = arith.constant 0 : index
    %66 = vector.load %arg2[%c7_53, %c0_54, %c0_55] : memref<9x8x4xf32, #tpu.memory_space<vmem>>, vector<1x8x4xf32>
    %67 = vector.shape_cast %66 : vector<1x8x4xf32> to vector<8x4xf32>
    %cst_56 = arith.constant dense<0.000000e+00> : vector<8x128xf32>
    %68 = tpu.matmul %67, %13, %cst_56 {dimension_numbers = #tpu.dot_dimension_numbers<[1], [0], [0], [1], [0, 0, 1, 1], [], []>} : vector<8x4xf32>, vector<4x128xf32>, vector<8x128xf32> -> vector<8x128xf32>
    %69 = arith.addf %65, %68 : vector<8x128xf32>
    %c8_57 = arith.constant 8 : index
    %c0_58 = arith.constant 0 : index
    %c0_59 = arith.constant 0 : index
    %70 = vector.load %arg2[%c8_57, %c0_58, %c0_59] : memref<9x8x4xf32, #tpu.memory_space<vmem>>, vector<1x8x4xf32>
    %71 = vector.shape_cast %70 : vector<1x8x4xf32> to vector<8x4xf32>
    %cst_60 = arith.constant dense<0.000000e+00> : vector<8x128xf32>
    %72 = tpu.matmul %71, %15, %cst_60 {dimension_numbers = #tpu.dot_dimension_numbers<[1], [0], [0], [1], [0, 0, 1, 1], [], []>} : vector<8x4xf32>, vector<4x128xf32>, vector<8x128xf32> -> vector<8x128xf32>
    %73 = arith.addf %69, %72 : vector<8x128xf32>
    %c0_61 = arith.constant 0 : index
    %c0_62 = arith.constant 0 : index
    %74 = vector.load %arg3[%c0_61, %c0_62] : memref<8x1xf32, #tpu.memory_space<vmem>>, vector<8x1xf32>
    %75 = vector.broadcast %74 : vector<8x1xf32> to vector<8x128xf32>
    %76 = arith.addf %73, %75 : vector<8x128xf32>
    %cst_63 = arith.constant 0.000000e+00 : f32
    %77 = vector.broadcast %cst_63 : f32 to vector<8x128xf32>
    %78 = arith.maximumf %76, %77 : vector<8x128xf32>
    %c4_64 = arith.constant 4 : index
    %c0_65 = arith.constant 0 : index
    %c0_66 = arith.constant 0 : index
    %79 = vector.load %arg4[%c4_64, %c0_65, %c0_66] : memref<9x8x8xf32, #tpu.memory_space<vmem>>, vector<1x8x8xf32>
    %80 = vector.shape_cast %79 : vector<1x8x8xf32> to vector<8x8xf32>
    %cst_67 = arith.constant dense<0.000000e+00> : vector<8x128xf32>
    %81 = tpu.matmul %80, %78, %cst_67 {dimension_numbers = #tpu.dot_dimension_numbers<[1], [0], [0], [1], [0, 0, 1, 1], [], []>} : vector<8x8xf32>, vector<8x128xf32>, vector<8x128xf32> -> vector<8x128xf32>
    %c0_68 = arith.constant 0 : index
    %c0_69 = arith.constant 0 : index
    %c0_70 = arith.constant 0 : index
    %82 = vector.load %arg4[%c0_68, %c0_69, %c0_70] : memref<9x8x8xf32, #tpu.memory_space<vmem>>, vector<1x8x8xf32>
    %83 = vector.shape_cast %82 : vector<1x8x8xf32> to vector<8x8xf32>
    %c9_i32_71 = arith.constant 9 : i32
    %84 = tpu.dynamic_rotate %78 by %c9_i32_71 dim 1 : vector<8x128xf32>, i32 -> vector<8x128xf32>
    %85 = vector.broadcast %0 : vector<1x128xf32> to vector<8x128xf32>
    %86 = arith.mulf %84, %85 : vector<8x128xf32>
    %cst_72 = arith.constant dense<0.000000e+00> : vector<8x128xf32>
    %87 = tpu.matmul %83, %86, %cst_72 {dimension_numbers = #tpu.dot_dimension_numbers<[1], [0], [0], [1], [0, 0, 1, 1], [], []>} : vector<8x8xf32>, vector<8x128xf32>, vector<8x128xf32> -> vector<8x128xf32>
    %88 = arith.addf %81, %87 : vector<8x128xf32>
    %c1_73 = arith.constant 1 : index
    %c0_74 = arith.constant 0 : index
    %c0_75 = arith.constant 0 : index
    %89 = vector.load %arg4[%c1_73, %c0_74, %c0_75] : memref<9x8x8xf32, #tpu.memory_space<vmem>>, vector<1x8x8xf32>
    %90 = vector.shape_cast %89 : vector<1x8x8xf32> to vector<8x8xf32>
    %c8_i32_76 = arith.constant 8 : i32
    %91 = tpu.dynamic_rotate %78 by %c8_i32_76 dim 1 : vector<8x128xf32>, i32 -> vector<8x128xf32>
    %92 = vector.broadcast %1 : vector<1x128xf32> to vector<8x128xf32>
    %93 = arith.mulf %91, %92 : vector<8x128xf32>
    %cst_77 = arith.constant dense<0.000000e+00> : vector<8x128xf32>
    %94 = tpu.matmul %90, %93, %cst_77 {dimension_numbers = #tpu.dot_dimension_numbers<[1], [0], [0], [1], [0, 0, 1, 1], [], []>} : vector<8x8xf32>, vector<8x128xf32>, vector<8x128xf32> -> vector<8x128xf32>
    %95 = arith.addf %88, %94 : vector<8x128xf32>
    %c2_78 = arith.constant 2 : index
    %c0_79 = arith.constant 0 : index
    %c0_80 = arith.constant 0 : index
    %96 = vector.load %arg4[%c2_78, %c0_79, %c0_80] : memref<9x8x8xf32, #tpu.memory_space<vmem>>, vector<1x8x8xf32>
    %97 = vector.shape_cast %96 : vector<1x8x8xf32> to vector<8x8xf32>
    %c7_i32 = arith.constant 7 : i32
    %98 = tpu.dynamic_rotate %78 by %c7_i32 dim 1 : vector<8x128xf32>, i32 -> vector<8x128xf32>
    %99 = vector.broadcast %2 : vector<1x128xf32> to vector<8x128xf32>
    %100 = arith.mulf %98, %99 : vector<8x128xf32>
    %cst_81 = arith.constant dense<0.000000e+00> : vector<8x128xf32>
    %101 = tpu.matmul %97, %100, %cst_81 {dimension_numbers = #tpu.dot_dimension_numbers<[1], [0], [0], [1], [0, 0, 1, 1], [], []>} : vector<8x8xf32>, vector<8x128xf32>, vector<8x128xf32> -> vector<8x128xf32>
    %102 = arith.addf %95, %101 : vector<8x128xf32>
    %c3_82 = arith.constant 3 : index
    %c0_83 = arith.constant 0 : index
    %c0_84 = arith.constant 0 : index
    %103 = vector.load %arg4[%c3_82, %c0_83, %c0_84] : memref<9x8x8xf32, #tpu.memory_space<vmem>>, vector<1x8x8xf32>
    %104 = vector.shape_cast %103 : vector<1x8x8xf32> to vector<8x8xf32>
    %c1_i32_85 = arith.constant 1 : i32
    %105 = tpu.dynamic_rotate %78 by %c1_i32_85 dim 1 : vector<8x128xf32>, i32 -> vector<8x128xf32>
    %106 = vector.broadcast %3 : vector<1x128xf32> to vector<8x128xf32>
    %107 = arith.mulf %105, %106 : vector<8x128xf32>
    %cst_86 = arith.constant dense<0.000000e+00> : vector<8x128xf32>
    %108 = tpu.matmul %104, %107, %cst_86 {dimension_numbers = #tpu.dot_dimension_numbers<[1], [0], [0], [1], [0, 0, 1, 1], [], []>} : vector<8x8xf32>, vector<8x128xf32>, vector<8x128xf32> -> vector<8x128xf32>
    %109 = arith.addf %102, %108 : vector<8x128xf32>
    %c5_87 = arith.constant 5 : index
    %c0_88 = arith.constant 0 : index
    %c0_89 = arith.constant 0 : index
    %110 = vector.load %arg4[%c5_87, %c0_88, %c0_89] : memref<9x8x8xf32, #tpu.memory_space<vmem>>, vector<1x8x8xf32>
    %111 = vector.shape_cast %110 : vector<1x8x8xf32> to vector<8x8xf32>
    %c127_i32 = arith.constant 127 : i32
    %112 = tpu.dynamic_rotate %78 by %c127_i32 dim 1 : vector<8x128xf32>, i32 -> vector<8x128xf32>
    %113 = vector.broadcast %4 : vector<1x128xf32> to vector<8x128xf32>
    %114 = arith.mulf %112, %113 : vector<8x128xf32>
    %cst_90 = arith.constant dense<0.000000e+00> : vector<8x128xf32>
    %115 = tpu.matmul %111, %114, %cst_90 {dimension_numbers = #tpu.dot_dimension_numbers<[1], [0], [0], [1], [0, 0, 1, 1], [], []>} : vector<8x8xf32>, vector<8x128xf32>, vector<8x128xf32> -> vector<8x128xf32>
    %116 = arith.addf %109, %115 : vector<8x128xf32>
    %c6_91 = arith.constant 6 : index
    %c0_92 = arith.constant 0 : index
    %c0_93 = arith.constant 0 : index
    %117 = vector.load %arg4[%c6_91, %c0_92, %c0_93] : memref<9x8x8xf32, #tpu.memory_space<vmem>>, vector<1x8x8xf32>
    %118 = vector.shape_cast %117 : vector<1x8x8xf32> to vector<8x8xf32>
    %c121_i32 = arith.constant 121 : i32
    %119 = tpu.dynamic_rotate %78 by %c121_i32 dim 1 : vector<8x128xf32>, i32 -> vector<8x128xf32>
    %120 = vector.broadcast %5 : vector<1x128xf32> to vector<8x128xf32>
    %121 = arith.mulf %119, %120 : vector<8x128xf32>
    %cst_94 = arith.constant dense<0.000000e+00> : vector<8x128xf32>
    %122 = tpu.matmul %118, %121, %cst_94 {dimension_numbers = #tpu.dot_dimension_numbers<[1], [0], [0], [1], [0, 0, 1, 1], [], []>} : vector<8x8xf32>, vector<8x128xf32>, vector<8x128xf32> -> vector<8x128xf32>
    %123 = arith.addf %116, %122 : vector<8x128xf32>
    %c7_95 = arith.constant 7 : index
    %c0_96 = arith.constant 0 : index
    %c0_97 = arith.constant 0 : index
    %124 = vector.load %arg4[%c7_95, %c0_96, %c0_97] : memref<9x8x8xf32, #tpu.memory_space<vmem>>, vector<1x8x8xf32>
    %125 = vector.shape_cast %124 : vector<1x8x8xf32> to vector<8x8xf32>
    %c120_i32 = arith.constant 120 : i32
    %126 = tpu.dynamic_rotate %78 by %c120_i32 dim 1 : vector<8x128xf32>, i32 -> vector<8x128xf32>
    %127 = vector.broadcast %6 : vector<1x128xf32> to vector<8x128xf32>
    %128 = arith.mulf %126, %127 : vector<8x128xf32>
    %cst_98 = arith.constant dense<0.000000e+00> : vector<8x128xf32>
    %129 = tpu.matmul %125, %128, %cst_98 {dimension_numbers = #tpu.dot_dimension_numbers<[1], [0], [0], [1], [0, 0, 1, 1], [], []>} : vector<8x8xf32>, vector<8x128xf32>, vector<8x128xf32> -> vector<8x128xf32>
    %130 = arith.addf %123, %129 : vector<8x128xf32>
    %c8_99 = arith.constant 8 : index
    %c0_100 = arith.constant 0 : index
    %c0_101 = arith.constant 0 : index
    %131 = vector.load %arg4[%c8_99, %c0_100, %c0_101] : memref<9x8x8xf32, #tpu.memory_space<vmem>>, vector<1x8x8xf32>
    %132 = vector.shape_cast %131 : vector<1x8x8xf32> to vector<8x8xf32>
    %c119_i32 = arith.constant 119 : i32
    %133 = tpu.dynamic_rotate %78 by %c119_i32 dim 1 : vector<8x128xf32>, i32 -> vector<8x128xf32>
    %134 = vector.broadcast %7 : vector<1x128xf32> to vector<8x128xf32>
    %135 = arith.mulf %133, %134 : vector<8x128xf32>
    %cst_102 = arith.constant dense<0.000000e+00> : vector<8x128xf32>
    %136 = tpu.matmul %132, %135, %cst_102 {dimension_numbers = #tpu.dot_dimension_numbers<[1], [0], [0], [1], [0, 0, 1, 1], [], []>} : vector<8x8xf32>, vector<8x128xf32>, vector<8x128xf32> -> vector<8x128xf32>
    %137 = arith.addf %130, %136 : vector<8x128xf32>
    %c0_103 = arith.constant 0 : index
    %c0_104 = arith.constant 0 : index
    %138 = vector.load %arg5[%c0_103, %c0_104] : memref<8x1xf32, #tpu.memory_space<vmem>>, vector<8x1xf32>
    %139 = vector.broadcast %138 : vector<8x1xf32> to vector<8x128xf32>
    %140 = arith.addf %137, %139 : vector<8x128xf32>
    %141 = arith.addf %140, %23 : vector<8x128xf32>
    %cst_105 = arith.constant 0.000000e+00 : f32
    %142 = vector.broadcast %cst_105 : f32 to vector<8x128xf32>
    %143 = arith.maximumf %141, %142 : vector<8x128xf32>
    %c4_106 = arith.constant 4 : index
    %c0_107 = arith.constant 0 : index
    %c0_108 = arith.constant 0 : index
    %144 = vector.load %arg6[%c4_106, %c0_107, %c0_108] : memref<9x8x8xf32, #tpu.memory_space<vmem>>, vector<1x8x8xf32>
    %145 = vector.shape_cast %144 : vector<1x8x8xf32> to vector<8x8xf32>
    %cst_109 = arith.constant dense<0.000000e+00> : vector<8x128xf32>
    %146 = tpu.matmul %145, %143, %cst_109 {dimension_numbers = #tpu.dot_dimension_numbers<[1], [0], [0], [1], [0, 0, 1, 1], [], []>} : vector<8x8xf32>, vector<8x128xf32>, vector<8x128xf32> -> vector<8x128xf32>
    %c0_110 = arith.constant 0 : index
    %c0_111 = arith.constant 0 : index
    %c0_112 = arith.constant 0 : index
    %147 = vector.load %arg6[%c0_110, %c0_111, %c0_112] : memref<9x8x8xf32, #tpu.memory_space<vmem>>, vector<1x8x8xf32>
    %148 = vector.shape_cast %147 : vector<1x8x8xf32> to vector<8x8xf32>
    %c9_i32_113 = arith.constant 9 : i32
    %149 = tpu.dynamic_rotate %143 by %c9_i32_113 dim 1 : vector<8x128xf32>, i32 -> vector<8x128xf32>
    %150 = vector.broadcast %0 : vector<1x128xf32> to vector<8x128xf32>
    %151 = arith.mulf %149, %150 : vector<8x128xf32>
    %cst_114 = arith.constant dense<0.000000e+00> : vector<8x128xf32>
    %152 = tpu.matmul %148, %151, %cst_114 {dimension_numbers = #tpu.dot_dimension_numbers<[1], [0], [0], [1], [0, 0, 1, 1], [], []>} : vector<8x8xf32>, vector<8x128xf32>, vector<8x128xf32> -> vector<8x128xf32>
    %153 = arith.addf %146, %152 : vector<8x128xf32>
    %c1_115 = arith.constant 1 : index
    %c0_116 = arith.constant 0 : index
    %c0_117 = arith.constant 0 : index
    %154 = vector.load %arg6[%c1_115, %c0_116, %c0_117] : memref<9x8x8xf32, #tpu.memory_space<vmem>>, vector<1x8x8xf32>
    %155 = vector.shape_cast %154 : vector<1x8x8xf32> to vector<8x8xf32>
    %c8_i32_118 = arith.constant 8 : i32
    %156 = tpu.dynamic_rotate %143 by %c8_i32_118 dim 1 : vector<8x128xf32>, i32 -> vector<8x128xf32>
    %157 = vector.broadcast %1 : vector<1x128xf32> to vector<8x128xf32>
    %158 = arith.mulf %156, %157 : vector<8x128xf32>
    %cst_119 = arith.constant dense<0.000000e+00> : vector<8x128xf32>
    %159 = tpu.matmul %155, %158, %cst_119 {dimension_numbers = #tpu.dot_dimension_numbers<[1], [0], [0], [1], [0, 0, 1, 1], [], []>} : vector<8x8xf32>, vector<8x128xf32>, vector<8x128xf32> -> vector<8x128xf32>
    %160 = arith.addf %153, %159 : vector<8x128xf32>
    %c2_120 = arith.constant 2 : index
    %c0_121 = arith.constant 0 : index
    %c0_122 = arith.constant 0 : index
    %161 = vector.load %arg6[%c2_120, %c0_121, %c0_122] : memref<9x8x8xf32, #tpu.memory_space<vmem>>, vector<1x8x8xf32>
    %162 = vector.shape_cast %161 : vector<1x8x8xf32> to vector<8x8xf32>
    %c7_i32_123 = arith.constant 7 : i32
    %163 = tpu.dynamic_rotate %143 by %c7_i32_123 dim 1 : vector<8x128xf32>, i32 -> vector<8x128xf32>
    %164 = vector.broadcast %2 : vector<1x128xf32> to vector<8x128xf32>
    %165 = arith.mulf %163, %164 : vector<8x128xf32>
    %cst_124 = arith.constant dense<0.000000e+00> : vector<8x128xf32>
    %166 = tpu.matmul %162, %165, %cst_124 {dimension_numbers = #tpu.dot_dimension_numbers<[1], [0], [0], [1], [0, 0, 1, 1], [], []>} : vector<8x8xf32>, vector<8x128xf32>, vector<8x128xf32> -> vector<8x128xf32>
    %167 = arith.addf %160, %166 : vector<8x128xf32>
    %c3_125 = arith.constant 3 : index
    %c0_126 = arith.constant 0 : index
    %c0_127 = arith.constant 0 : index
    %168 = vector.load %arg6[%c3_125, %c0_126, %c0_127] : memref<9x8x8xf32, #tpu.memory_space<vmem>>, vector<1x8x8xf32>
    %169 = vector.shape_cast %168 : vector<1x8x8xf32> to vector<8x8xf32>
    %c1_i32_128 = arith.constant 1 : i32
    %170 = tpu.dynamic_rotate %143 by %c1_i32_128 dim 1 : vector<8x128xf32>, i32 -> vector<8x128xf32>
    %171 = vector.broadcast %3 : vector<1x128xf32> to vector<8x128xf32>
    %172 = arith.mulf %170, %171 : vector<8x128xf32>
    %cst_129 = arith.constant dense<0.000000e+00> : vector<8x128xf32>
    %173 = tpu.matmul %169, %172, %cst_129 {dimension_numbers = #tpu.dot_dimension_numbers<[1], [0], [0], [1], [0, 0, 1, 1], [], []>} : vector<8x8xf32>, vector<8x128xf32>, vector<8x128xf32> -> vector<8x128xf32>
    %174 = arith.addf %167, %173 : vector<8x128xf32>
    %c5_130 = arith.constant 5 : index
    %c0_131 = arith.constant 0 : index
    %c0_132 = arith.constant 0 : index
    %175 = vector.load %arg6[%c5_130, %c0_131, %c0_132] : memref<9x8x8xf32, #tpu.memory_space<vmem>>, vector<1x8x8xf32>
    %176 = vector.shape_cast %175 : vector<1x8x8xf32> to vector<8x8xf32>
    %c127_i32_133 = arith.constant 127 : i32
    %177 = tpu.dynamic_rotate %143 by %c127_i32_133 dim 1 : vector<8x128xf32>, i32 -> vector<8x128xf32>
    %178 = vector.broadcast %4 : vector<1x128xf32> to vector<8x128xf32>
    %179 = arith.mulf %177, %178 : vector<8x128xf32>
    %cst_134 = arith.constant dense<0.000000e+00> : vector<8x128xf32>
    %180 = tpu.matmul %176, %179, %cst_134 {dimension_numbers = #tpu.dot_dimension_numbers<[1], [0], [0], [1], [0, 0, 1, 1], [], []>} : vector<8x8xf32>, vector<8x128xf32>, vector<8x128xf32> -> vector<8x128xf32>
    %181 = arith.addf %174, %180 : vector<8x128xf32>
    %c6_135 = arith.constant 6 : index
    %c0_136 = arith.constant 0 : index
    %c0_137 = arith.constant 0 : index
    %182 = vector.load %arg6[%c6_135, %c0_136, %c0_137] : memref<9x8x8xf32, #tpu.memory_space<vmem>>, vector<1x8x8xf32>
    %183 = vector.shape_cast %182 : vector<1x8x8xf32> to vector<8x8xf32>
    %c121_i32_138 = arith.constant 121 : i32
    %184 = tpu.dynamic_rotate %143 by %c121_i32_138 dim 1 : vector<8x128xf32>, i32 -> vector<8x128xf32>
    %185 = vector.broadcast %5 : vector<1x128xf32> to vector<8x128xf32>
    %186 = arith.mulf %184, %185 : vector<8x128xf32>
    %cst_139 = arith.constant dense<0.000000e+00> : vector<8x128xf32>
    %187 = tpu.matmul %183, %186, %cst_139 {dimension_numbers = #tpu.dot_dimension_numbers<[1], [0], [0], [1], [0, 0, 1, 1], [], []>} : vector<8x8xf32>, vector<8x128xf32>, vector<8x128xf32> -> vector<8x128xf32>
    %188 = arith.addf %181, %187 : vector<8x128xf32>
    %c7_140 = arith.constant 7 : index
    %c0_141 = arith.constant 0 : index
    %c0_142 = arith.constant 0 : index
    %189 = vector.load %arg6[%c7_140, %c0_141, %c0_142] : memref<9x8x8xf32, #tpu.memory_space<vmem>>, vector<1x8x8xf32>
    %190 = vector.shape_cast %189 : vector<1x8x8xf32> to vector<8x8xf32>
    %c120_i32_143 = arith.constant 120 : i32
    %191 = tpu.dynamic_rotate %143 by %c120_i32_143 dim 1 : vector<8x128xf32>, i32 -> vector<8x128xf32>
    %192 = vector.broadcast %6 : vector<1x128xf32> to vector<8x128xf32>
    %193 = arith.mulf %191, %192 : vector<8x128xf32>
    %cst_144 = arith.constant dense<0.000000e+00> : vector<8x128xf32>
    %194 = tpu.matmul %190, %193, %cst_144 {dimension_numbers = #tpu.dot_dimension_numbers<[1], [0], [0], [1], [0, 0, 1, 1], [], []>} : vector<8x8xf32>, vector<8x128xf32>, vector<8x128xf32> -> vector<8x128xf32>
    %195 = arith.addf %188, %194 : vector<8x128xf32>
    %c8_145 = arith.constant 8 : index
    %c0_146 = arith.constant 0 : index
    %c0_147 = arith.constant 0 : index
    %196 = vector.load %arg6[%c8_145, %c0_146, %c0_147] : memref<9x8x8xf32, #tpu.memory_space<vmem>>, vector<1x8x8xf32>
    %197 = vector.shape_cast %196 : vector<1x8x8xf32> to vector<8x8xf32>
    %c119_i32_148 = arith.constant 119 : i32
    %198 = tpu.dynamic_rotate %143 by %c119_i32_148 dim 1 : vector<8x128xf32>, i32 -> vector<8x128xf32>
    %199 = vector.broadcast %7 : vector<1x128xf32> to vector<8x128xf32>
    %200 = arith.mulf %198, %199 : vector<8x128xf32>
    %cst_149 = arith.constant dense<0.000000e+00> : vector<8x128xf32>
    %201 = tpu.matmul %197, %200, %cst_149 {dimension_numbers = #tpu.dot_dimension_numbers<[1], [0], [0], [1], [0, 0, 1, 1], [], []>} : vector<8x8xf32>, vector<8x128xf32>, vector<8x128xf32> -> vector<8x128xf32>
    %202 = arith.addf %195, %201 : vector<8x128xf32>
    %c0_150 = arith.constant 0 : index
    %c0_151 = arith.constant 0 : index
    %203 = vector.load %arg7[%c0_150, %c0_151] : memref<8x1xf32, #tpu.memory_space<vmem>>, vector<8x1xf32>
    %204 = vector.broadcast %203 : vector<8x1xf32> to vector<8x128xf32>
    %205 = arith.addf %202, %204 : vector<8x128xf32>
    %cst_152 = arith.constant 0.000000e+00 : f32
    %206 = vector.broadcast %cst_152 : f32 to vector<8x128xf32>
    %207 = arith.maximumf %205, %206 : vector<8x128xf32>
    %c4_153 = arith.constant 4 : index
    %c0_154 = arith.constant 0 : index
    %c0_155 = arith.constant 0 : index
    %208 = vector.load %arg8[%c4_153, %c0_154, %c0_155] : memref<9x8x8xf32, #tpu.memory_space<vmem>>, vector<1x8x8xf32>
    %209 = vector.shape_cast %208 : vector<1x8x8xf32> to vector<8x8xf32>
    %cst_156 = arith.constant dense<0.000000e+00> : vector<8x128xf32>
    %210 = tpu.matmul %209, %207, %cst_156 {dimension_numbers = #tpu.dot_dimension_numbers<[1], [0], [0], [1], [0, 0, 1, 1], [], []>} : vector<8x8xf32>, vector<8x128xf32>, vector<8x128xf32> -> vector<8x128xf32>
    %c0_157 = arith.constant 0 : index
    %c0_158 = arith.constant 0 : index
    %c0_159 = arith.constant 0 : index
    %211 = vector.load %arg8[%c0_157, %c0_158, %c0_159] : memref<9x8x8xf32, #tpu.memory_space<vmem>>, vector<1x8x8xf32>
    %212 = vector.shape_cast %211 : vector<1x8x8xf32> to vector<8x8xf32>
    %c9_i32_160 = arith.constant 9 : i32
    %213 = tpu.dynamic_rotate %207 by %c9_i32_160 dim 1 : vector<8x128xf32>, i32 -> vector<8x128xf32>
    %214 = vector.broadcast %0 : vector<1x128xf32> to vector<8x128xf32>
    %215 = arith.mulf %213, %214 : vector<8x128xf32>
    %cst_161 = arith.constant dense<0.000000e+00> : vector<8x128xf32>
    %216 = tpu.matmul %212, %215, %cst_161 {dimension_numbers = #tpu.dot_dimension_numbers<[1], [0], [0], [1], [0, 0, 1, 1], [], []>} : vector<8x8xf32>, vector<8x128xf32>, vector<8x128xf32> -> vector<8x128xf32>
    %217 = arith.addf %210, %216 : vector<8x128xf32>
    %c1_162 = arith.constant 1 : index
    %c0_163 = arith.constant 0 : index
    %c0_164 = arith.constant 0 : index
    %218 = vector.load %arg8[%c1_162, %c0_163, %c0_164] : memref<9x8x8xf32, #tpu.memory_space<vmem>>, vector<1x8x8xf32>
    %219 = vector.shape_cast %218 : vector<1x8x8xf32> to vector<8x8xf32>
    %c8_i32_165 = arith.constant 8 : i32
    %220 = tpu.dynamic_rotate %207 by %c8_i32_165 dim 1 : vector<8x128xf32>, i32 -> vector<8x128xf32>
    %221 = vector.broadcast %1 : vector<1x128xf32> to vector<8x128xf32>
    %222 = arith.mulf %220, %221 : vector<8x128xf32>
    %cst_166 = arith.constant dense<0.000000e+00> : vector<8x128xf32>
    %223 = tpu.matmul %219, %222, %cst_166 {dimension_numbers = #tpu.dot_dimension_numbers<[1], [0], [0], [1], [0, 0, 1, 1], [], []>} : vector<8x8xf32>, vector<8x128xf32>, vector<8x128xf32> -> vector<8x128xf32>
    %224 = arith.addf %217, %223 : vector<8x128xf32>
    %c2_167 = arith.constant 2 : index
    %c0_168 = arith.constant 0 : index
    %c0_169 = arith.constant 0 : index
    %225 = vector.load %arg8[%c2_167, %c0_168, %c0_169] : memref<9x8x8xf32, #tpu.memory_space<vmem>>, vector<1x8x8xf32>
    %226 = vector.shape_cast %225 : vector<1x8x8xf32> to vector<8x8xf32>
    %c7_i32_170 = arith.constant 7 : i32
    %227 = tpu.dynamic_rotate %207 by %c7_i32_170 dim 1 : vector<8x128xf32>, i32 -> vector<8x128xf32>
    %228 = vector.broadcast %2 : vector<1x128xf32> to vector<8x128xf32>
    %229 = arith.mulf %227, %228 : vector<8x128xf32>
    %cst_171 = arith.constant dense<0.000000e+00> : vector<8x128xf32>
    %230 = tpu.matmul %226, %229, %cst_171 {dimension_numbers = #tpu.dot_dimension_numbers<[1], [0], [0], [1], [0, 0, 1, 1], [], []>} : vector<8x8xf32>, vector<8x128xf32>, vector<8x128xf32> -> vector<8x128xf32>
    %231 = arith.addf %224, %230 : vector<8x128xf32>
    %c3_172 = arith.constant 3 : index
    %c0_173 = arith.constant 0 : index
    %c0_174 = arith.constant 0 : index
    %232 = vector.load %arg8[%c3_172, %c0_173, %c0_174] : memref<9x8x8xf32, #tpu.memory_space<vmem>>, vector<1x8x8xf32>
    %233 = vector.shape_cast %232 : vector<1x8x8xf32> to vector<8x8xf32>
    %c1_i32_175 = arith.constant 1 : i32
    %234 = tpu.dynamic_rotate %207 by %c1_i32_175 dim 1 : vector<8x128xf32>, i32 -> vector<8x128xf32>
    %235 = vector.broadcast %3 : vector<1x128xf32> to vector<8x128xf32>
    %236 = arith.mulf %234, %235 : vector<8x128xf32>
    %cst_176 = arith.constant dense<0.000000e+00> : vector<8x128xf32>
    %237 = tpu.matmul %233, %236, %cst_176 {dimension_numbers = #tpu.dot_dimension_numbers<[1], [0], [0], [1], [0, 0, 1, 1], [], []>} : vector<8x8xf32>, vector<8x128xf32>, vector<8x128xf32> -> vector<8x128xf32>
    %238 = arith.addf %231, %237 : vector<8x128xf32>
    %c5_177 = arith.constant 5 : index
    %c0_178 = arith.constant 0 : index
    %c0_179 = arith.constant 0 : index
    %239 = vector.load %arg8[%c5_177, %c0_178, %c0_179] : memref<9x8x8xf32, #tpu.memory_space<vmem>>, vector<1x8x8xf32>
    %240 = vector.shape_cast %239 : vector<1x8x8xf32> to vector<8x8xf32>
    %c127_i32_180 = arith.constant 127 : i32
    %241 = tpu.dynamic_rotate %207 by %c127_i32_180 dim 1 : vector<8x128xf32>, i32 -> vector<8x128xf32>
    %242 = vector.broadcast %4 : vector<1x128xf32> to vector<8x128xf32>
    %243 = arith.mulf %241, %242 : vector<8x128xf32>
    %cst_181 = arith.constant dense<0.000000e+00> : vector<8x128xf32>
    %244 = tpu.matmul %240, %243, %cst_181 {dimension_numbers = #tpu.dot_dimension_numbers<[1], [0], [0], [1], [0, 0, 1, 1], [], []>} : vector<8x8xf32>, vector<8x128xf32>, vector<8x128xf32> -> vector<8x128xf32>
    %245 = arith.addf %238, %244 : vector<8x128xf32>
    %c6_182 = arith.constant 6 : index
    %c0_183 = arith.constant 0 : index
    %c0_184 = arith.constant 0 : index
    %246 = vector.load %arg8[%c6_182, %c0_183, %c0_184] : memref<9x8x8xf32, #tpu.memory_space<vmem>>, vector<1x8x8xf32>
    %247 = vector.shape_cast %246 : vector<1x8x8xf32> to vector<8x8xf32>
    %c121_i32_185 = arith.constant 121 : i32
    %248 = tpu.dynamic_rotate %207 by %c121_i32_185 dim 1 : vector<8x128xf32>, i32 -> vector<8x128xf32>
    %249 = vector.broadcast %5 : vector<1x128xf32> to vector<8x128xf32>
    %250 = arith.mulf %248, %249 : vector<8x128xf32>
    %cst_186 = arith.constant dense<0.000000e+00> : vector<8x128xf32>
    %251 = tpu.matmul %247, %250, %cst_186 {dimension_numbers = #tpu.dot_dimension_numbers<[1], [0], [0], [1], [0, 0, 1, 1], [], []>} : vector<8x8xf32>, vector<8x128xf32>, vector<8x128xf32> -> vector<8x128xf32>
    %252 = arith.addf %245, %251 : vector<8x128xf32>
    %c7_187 = arith.constant 7 : index
    %c0_188 = arith.constant 0 : index
    %c0_189 = arith.constant 0 : index
    %253 = vector.load %arg8[%c7_187, %c0_188, %c0_189] : memref<9x8x8xf32, #tpu.memory_space<vmem>>, vector<1x8x8xf32>
    %254 = vector.shape_cast %253 : vector<1x8x8xf32> to vector<8x8xf32>
    %c120_i32_190 = arith.constant 120 : i32
    %255 = tpu.dynamic_rotate %207 by %c120_i32_190 dim 1 : vector<8x128xf32>, i32 -> vector<8x128xf32>
    %256 = vector.broadcast %6 : vector<1x128xf32> to vector<8x128xf32>
    %257 = arith.mulf %255, %256 : vector<8x128xf32>
    %cst_191 = arith.constant dense<0.000000e+00> : vector<8x128xf32>
    %258 = tpu.matmul %254, %257, %cst_191 {dimension_numbers = #tpu.dot_dimension_numbers<[1], [0], [0], [1], [0, 0, 1, 1], [], []>} : vector<8x8xf32>, vector<8x128xf32>, vector<8x128xf32> -> vector<8x128xf32>
    %259 = arith.addf %252, %258 : vector<8x128xf32>
    %c8_192 = arith.constant 8 : index
    %c0_193 = arith.constant 0 : index
    %c0_194 = arith.constant 0 : index
    %260 = vector.load %arg8[%c8_192, %c0_193, %c0_194] : memref<9x8x8xf32, #tpu.memory_space<vmem>>, vector<1x8x8xf32>
    %261 = vector.shape_cast %260 : vector<1x8x8xf32> to vector<8x8xf32>
    %c119_i32_195 = arith.constant 119 : i32
    %262 = tpu.dynamic_rotate %207 by %c119_i32_195 dim 1 : vector<8x128xf32>, i32 -> vector<8x128xf32>
    %263 = vector.broadcast %7 : vector<1x128xf32> to vector<8x128xf32>
    %264 = arith.mulf %262, %263 : vector<8x128xf32>
    %cst_196 = arith.constant dense<0.000000e+00> : vector<8x128xf32>
    %265 = tpu.matmul %261, %264, %cst_196 {dimension_numbers = #tpu.dot_dimension_numbers<[1], [0], [0], [1], [0, 0, 1, 1], [], []>} : vector<8x8xf32>, vector<8x128xf32>, vector<8x128xf32> -> vector<8x128xf32>
    %266 = arith.addf %259, %265 : vector<8x128xf32>
    %c0_197 = arith.constant 0 : index
    %c0_198 = arith.constant 0 : index
    %267 = vector.load %arg9[%c0_197, %c0_198] : memref<8x1xf32, #tpu.memory_space<vmem>>, vector<8x1xf32>
    %268 = vector.broadcast %267 : vector<8x1xf32> to vector<8x128xf32>
    %269 = arith.addf %266, %268 : vector<8x128xf32>
    %270 = arith.addf %269, %143 : vector<8x128xf32>
    %cst_199 = arith.constant 0.000000e+00 : f32
    %271 = vector.broadcast %cst_199 : f32 to vector<8x128xf32>
    %272 = arith.maximumf %270, %271 : vector<8x128xf32>
    %c0_200 = arith.constant 0 : index
    %c0_201 = arith.constant 0 : index
    %273 = vector.load %arg12[%c0_200, %c0_201] : memref<8x8xf32, #tpu.memory_space<vmem>>, vector<8x8xf32>
    %cst_202 = arith.constant dense<0.000000e+00> : vector<8x128xf32>
    %274 = tpu.matmul %273, %272, %cst_202 {dimension_numbers = #tpu.dot_dimension_numbers<[1], [0], [0], [1], [0, 0, 1, 1], [], []>} : vector<8x8xf32>, vector<8x128xf32>, vector<8x128xf32> -> vector<8x128xf32>
    %c0_203 = arith.constant 0 : index
    %c0_204 = arith.constant 0 : index
    %275 = vector.load %arg13[%c0_203, %c0_204] : memref<8x8xf32, #tpu.memory_space<vmem>>, vector<8x8xf32>
    %cst_205 = arith.constant dense<0.000000e+00> : vector<8x128xf32>
    %276 = tpu.matmul %275, %143, %cst_205 {dimension_numbers = #tpu.dot_dimension_numbers<[1], [0], [0], [1], [0, 0, 1, 1], [], []>} : vector<8x8xf32>, vector<8x128xf32>, vector<8x128xf32> -> vector<8x128xf32>
    %277 = arith.addf %274, %276 : vector<8x128xf32>
    %c0_206 = arith.constant 0 : index
    %c0_207 = arith.constant 0 : index
    %278 = vector.load %arg14[%c0_206, %c0_207] : memref<8x4xf32, #tpu.memory_space<vmem>>, vector<8x4xf32>
    %cst_208 = arith.constant dense<0.000000e+00> : vector<8x128xf32>
    %279 = tpu.matmul %278, %18, %cst_208 {dimension_numbers = #tpu.dot_dimension_numbers<[1], [0], [0], [1], [0, 0, 1, 1], [], []>} : vector<8x4xf32>, vector<4x128xf32>, vector<8x128xf32> -> vector<8x128xf32>
    %280 = arith.addf %277, %279 : vector<8x128xf32>
    %c0_209 = arith.constant 0 : index
    %c0_210 = arith.constant 0 : index
    %281 = vector.load %arg15[%c0_209, %c0_210] : memref<8x1xf32, #tpu.memory_space<vmem>>, vector<8x1xf32>
    %282 = vector.broadcast %281 : vector<8x1xf32> to vector<8x128xf32>
    %283 = arith.addf %280, %282 : vector<8x128xf32>
    %cst_211 = arith.constant 0.000000e+00 : f32
    %284 = vector.broadcast %cst_211 : f32 to vector<8x128xf32>
    %285 = arith.maximumf %283, %284 : vector<8x128xf32>
    %c0_212 = arith.constant 0 : index
    %c0_213 = arith.constant 0 : index
    %286 = vector.load %arg16[%c0_212, %c0_213] : memref<8x128xf32, #tpu.memory_space<vmem>>, vector<8x128xf32>
    tpu.vector_store %arg16[%c0_212, %c0_213], %285 {strides = array<i32>} : memref<8x128xf32, #tpu.memory_space<vmem>>, vector<8x128xf32>,
    return
  }
}

</mosaic_0001>

<bundles_post_ra>
// kernel: tree_forward.1
= control target key start
LH: loop header
LB: loop body
LE: loop exit
PB: predicated region body
PF: predicated region fallthrough
CT: control target
= control target key end

     0   :  { %s1379_s26 = smov 9   ;;  %s1380_s27 = smov 8   ;;  %vm82_vm0 = vcmask 1043456   ;;  %vm78_vm1 = vcmask 31744   ;;  %v1382_v9 = vmov 0   ;;  %vm396_vm2 = vcmask 64512   ;;  %s1795_s0 = inlined_call_operand.vmem [shape: f32[4,4,128], index: 0, kind: input, shape index: {}]   ;;  %s1796_s1 = inlined_call_operand.vmem [shape: f32[9,128], index: 1, kind: input, shape index: {}]   ;;  %s1797_s10 = inlined_call_operand.vmem [shape: f32[8,4], index: 10, kind: input, shape index: {}]   ;;  %s1798_s3 = inlined_call_operand.vmem [shape: f32[8,1], index: 3, kind: input, shape index: {}]   ;;  %s1799_s2 = inlined_call_operand.vmem [shape: f32[9,8,4], index: 2, kind: input, shape index: {}]   ;;  %s1800_s11 = inlined_call_operand.vmem [shape: f32[8,1], index: 11, kind: input, shape index: {}]   ;;  %s1801_s4 = inlined_call_operand.vmem [shape: f32[9,8,8], index: 4, kind: input, shape index: {}]   ;;  %s1802_s5 = inlined_call_operand.vmem [shape: f32[8,1], index: 5, kind: input, shape index: {}]   ;;  %s1803_s6 = inlined_call_operand.vmem [shape: f32[9,8,8], index: 6, kind: input, shape index: {}]   ;;  %s1804_s7 = inlined_call_operand.vmem [shape: f32[8,1], index: 7, kind: input, shape index: {}]   ;;  %s1805_s9 = inlined_call_operand.vmem [shape: f32[8,1], index: 9, kind: input, shape index: {}]   ;;  %s1806_s15 = inlined_call_operand.vmem [shape: f32[8,1], index: 15, kind: input, shape index: {}]   ;;  %s1807_s8 = inlined_call_operand.vmem [shape: f32[9,8,8], index: 8, kind: input, shape index: {}]   ;;  %s1808_s14 = inlined_call_operand.vmem [shape: f32[8,4], index: 14, kind: input, shape index: {}]   ;;  %s1809_s13 = inlined_call_operand.vmem [shape: f32[8,8], index: 13, kind: input, shape index: {}]   ;;  %s1810_s12 = inlined_call_operand.vmem [shape: f32[8,8], index: 12, kind: input, shape index: {}]   ;;  %s1811_s16 = inlined_call_operand.vmem [shape: f32[8,128], index: 16, kind: output, shape index: {}]  }
   0x1   :  { %1813 = sst [smem:[#allocation2_spill]] %s1795_s0  ;;  %s1381_s28 = smov 1   ;;  %v71_v7 = vld [vmem:[%s1797_s10] sm:$0xff]  ;;  %1368 = vset.pattern.permute.xlu2 %v1382_v9  ;;  %1369 = vset.pattern.permute.xlu0 %v1382_v9  ;;  %v1278_v17 = vld [vmem:[%s1799_s2 + $0x8] sm:$0xff]  ;;  %v1283_v23 = vld [vmem:[%s1799_s2 + $0x10] sm:$0xff] }
   0x2   :  { %s1814_s23 = sld [smem:[#allocation2_spill]]  ;;  %v382_v8 = vld [vmem:[%s1798_s3] sm:$0xff]  ;;  %1370 = vset.pattern.permute.xlu1 %v1382_v9  ;;  %v1292_v26 = vld [vmem:[%s1799_s2 + $0x28] sm:$0xff]  ;;  %v1286_v27 = vld [vmem:[%s1799_s2 + $0x18] sm:$0xff]  ;;  %s1384_s18 = smov 7  }
   0x3   :  { %v1504_v10 = vld [vmem:[%s1796_s1] ss:$0 sm:$0xff]  ;;  %v1509_v11 = vld [vmem:[%s1796_s1 + $0x1] ss:$0 sm:$0xff]  ;;  %v1526_v18 = vld [vmem:[%s1796_s1 + $0x3] ss:$0 sm:$0xff] }
   0x4   :  { %v106_v15 = vld [vmem:[%s1799_s2] sm:$0xff]  ;;  %v1295_v29 = vld [vmem:[%s1799_s2 + $0x30] sm:$0xff]  ;;  %v1298_v30 = vld [vmem:[%s1799_s2 + $0x38] sm:$0xff]  ;;  %s1385_s19 = smov 127   ;;  %s1386_s22 = smov 120  }
   0x5   :  { %v1289_v28 = vld [vmem:[%s1799_s2 + $0x20] sm:$0xff]  ;;  %v1307_v57 = vld [vmem:[%s1801_s4 + $0x8] sm:$0xff]  ;;  %v1309_v9 = vld [vmem:[%s1801_s4 + $0x10] sm:$0xff] }
   0x6   :  { %v1301_v31 = vld [vmem:[%s1799_s2 + $0x40] sm:$0xff]  ;;  %s1383_s2 = smov 119   ;;  %v1594_v60 = vld [vmem:[%s1796_s1 + $0x8] ss:$0 sm:$0xff] }
   0x7   :  { %v72_v53 = vld [vmem:[%s1800_s11] sm:$0xff] }
   0x8   :  { %v1275_v0 = vld [vmem:[%s1814_s23 + $0xc] sm:$0xf]  ;;  %v1274_v1 = vld [vmem:[%s1814_s23 + $0x8] sm:$0xf]  ;;  %v1273_v2 = vld [vmem:[%s1814_s23 + $0x4] sm:$0xf] }
   0x9   :  { %107 = vrot.lane.b32.xlu0 %v1275_v0, %s1379_s26  ;;  %113 = vrot.lane.b32.xlu1 %v1274_v1, %s1380_s27  ;;  %v61_v3 = vld [vmem:[%s1814_s23] sm:$0xf]  ;;  %v69_v5 = vmax.f32 %v1274_v1, %v1275_v0  ;;  %s1387_s23 = smov 121  }
   0xa   :  { %294 = vrot.lane.b32.xlu2 %v1275_v0, %s1381_s28  ;;  %v68_v4 = vmax.f32 %v61_v3, %v1273_v2  ;;  %v1304_v54 = vld [vmem:[%s1801_s4 + $0x20] sm:$0xff] }
   0xb   :  { %v651_v58 = vld [vmem:[%s1802_s5] sm:$0xff] }
   0xc   :  { %v1490_v6 = vmax.f32 %v68_v4, %v69_v5  ;;  %v1611_v4 = vld [vmem:[%s1796_s1 + $0x5] ss:$0 sm:$0xff] }
   0xe   :  { %1276 = vmatpush.msk.msra.mxu0 %vm82_vm0, %v1490_v6 }
   0xf   :  { %1277 = vmatmul.msk.f32.vlgmr.msra.gmra.mxu0 %vm78_vm1, %v71_v7 }
  0x11   :  { %171 = vrot.lane.b32.xlu0 %v1275_v0, %s1380_s27  ;;  %203 = vrot.lane.b32.xlu1 %v1273_v2, %s1381_s28 }
  0x12   :  { %385 = vperm.xlu2 %1368, %v382_v8  }
  0x64   :  { %v295_v19 = vpop.permute.xlu2 %294 }
  0x65   :  { %v296_v24 = vmul.f32 %v1526_v18, %v295_v19 }
  0x6c   :  { %v386_v49 = vpop.permute.xlu2 %385 }
  0x7b   :  { %v108_v12 = vpop.permute.xlu0 %107  ;;  %v114_v13 = vpop.permute.xlu1 %113 }
  0x7c   :  { %v110_v14 = vmul.f32 %v1504_v10, %v108_v12  ;;  %v116_v16 = vmul.f32 %v1509_v11, %v114_v13  ;;  %v1311_v13 = vld [vmem:[%s1801_s4 + $0x18] sm:$0xff] }
  0x7e   :  { %1281 = vmatpush.msk.msra.mxu2 %vm82_vm0, %v110_v14  ;;  %1279 = vmatpush.msk.msra.mxu1 %vm82_vm0, %v116_v16  ;;  %v1313_v14 = vld [vmem:[%s1801_s4 + $0x28] sm:$0xff]  ;;  %v1635_v16 = vld [vmem:[%s1796_s1 + $0x6] ss:$0 sm:$0xff] }
  0x7f   :  { %1282 = vmatmul.msk.f32.vlgmr.msra.gmra.mxu2 %vm78_vm1, %v106_v15  ;;  %1280 = vmatmul.msk.f32.vlgmr.msra.gmra.mxu1 %vm78_vm1, %v1278_v17  ;;  %v1630_v15 = vld [vmem:[%s1796_s1 + $0x7] ss:$0 sm:$0xff] }
  0x80   :  { %1293 = vmatpush.msk.msrb.mxu2 %vm82_vm0, %v1273_v2  ;;  %1290 = vmatpush.msk.msrb.mxu1 %vm82_vm0, %v61_v3  ;;  %v1606_v3 = vld [vmem:[%s1796_s1 + $0x2] ss:$0 sm:$0xff] }
  0x82   :  { %1302 = vmatpush.msk.msra.mxu1 %vm82_vm0, %v1275_v0 }
  0x83   :  { %v172_v20 = vpop.permute.xlu0 %171  ;;  %v204_v21 = vpop.permute.xlu1 %203 }
  0x84   :  { %v173_v22 = vmul.f32 %v1509_v11, %v172_v20  ;;  %v206_v25 = vmul.f32 %v1526_v18, %v204_v21  ;;  %v1317_v21 = vld [vmem:[%s1801_s4 + $0x38] sm:$0xff] }
  0x86   :  { %1284 = vmatpush.msk.msra.mxu3 %vm82_vm0, %v173_v22  ;;  %1287 = vmatpush.msk.msrb.mxu0 %vm82_vm0, %v206_v25 }
  0x87   :  { %1285 = vmatmul.msk.f32.vlgmr.msra.gmra.mxu3 %vm78_vm1, %v1283_v23  ;;  %1294 = vmatmul.msk.f32.vlgmr.msrb.gmra.mxu2 %vm78_vm1, %v1292_v26  ;;  %v1319_v23 = vld [vmem:[%s1801_s4 + $0x40] sm:$0xff] }
  0x88   :  { %1296 = vmatpush.msk.msrb.mxu3 %vm82_vm0, %v296_v24  ;;  %1288 = vmatmul.msk.f32.vlgmr.msrb.gmra.mxu0 %vm78_vm1, %v1286_v27  ;;  %v1315_v24 = vld [vmem:[%s1801_s4 + $0x30] sm:$0xff] }
  0x89   :  { %1291 = vmatmul.msk.f32.vlgmr.msrb.gmra.mxu1 %vm78_vm1, %v1289_v28  ;;  %1299 = vmatpush.msk.msra.mxu0 %vm82_vm0, %v1274_v1  ;;  %v392_v1 = vld [vmem:[%s1801_s4] sm:$0xff] }
  0x8c   :  { %v1566_v32 = vpop.f32.mrf.mxu0 }
  0x8f   :  { %1297 = vmatmul.msk.f32.vlgmr.msrb.gmra.mxu3 %vm78_vm1, %v1295_v29 }
  0x90   :  { %1300 = vmatmul.msk.f32.vlgmr.msra.gmra.mxu0 %vm78_vm1, %v1298_v30 }
  0x91   :  { %1303 = vmatmul.msk.f32.vlgmr.msra.gmra.mxu1 %vm78_vm1, %v1301_v31 }
  0xfc   :  { %v140_v33 = vpop.f32.mrf.mxu1 }
 0x102   :  { %v166_v34 = vpop.f32.mrf.mxu2 }
 0x103   :  { %v167_v36 = vadd.f32 %v166_v34, %v140_v33 }
 0x105   :  { %v230_v35 = vpop.f32.mrf.mxu0 }
 0x106   :  { %v259_v38 = vpop.f32.mrf.mxu1 }
 0x10a   :  { %v197_v37 = vpop.f32.mrf.mxu3  ;;  %v288_v41 = vpop.f32.mrf.mxu2 }
 0x10b   :  { %v200_v39 = vadd.f32 %v197_v37, %v167_v36 }
 0x10d   :  { %v233_v40 = vadd.f32 %v230_v35, %v200_v39  ;;  %v349_v45 = vpop.f32.mrf.mxu0 }
 0x10e   :  { %v378_v47 = vpop.f32.mrf.mxu1 }
 0x10f   :  { %v262_v42 = vadd.f32 %v259_v38, %v233_v40 }
 0x111   :  { %v291_v43 = vadd.f32 %v288_v41, %v262_v42 }
 0x112   :  { %v320_v44 = vpop.f32.mrf.mxu3 }
 0x113   :  { %v323_v46 = vadd.f32 %v320_v44, %v291_v43 }
 0x115   :  { %v352_v48 = vadd.f32 %v349_v45, %v323_v46 }
 0x117   :  { %v381_v50 = vadd.f32 %v378_v47, %v352_v48 }
 0x119   :  { %v388_v51 = vadd.f32 %v386_v49, %v381_v50  ;;  %v1326_v50 = vld [vmem:[%s1803_s6 + $0x10] sm:$0xff] }
 0x11b   :  { %v389_v52 = vmax.f32 %v388_v51, 0.0  ;;  %v1321_v51 = vld [vmem:[%s1803_s6 + $0x20] sm:$0xff] }
 0x11d   :  { %445 = vrot.lane.b32.xlu2 %v389_v52, %s1380_s27  ;;  %504 = vrot.lane.b32.xlu1 %v389_v52, %s1381_s28 }
 0x11e   :  { %393 = vrot.lane.b32.xlu0 %v389_v52, %s1379_s26  ;;  %438 = vmatpush.msra.mxu3 %v389_v52 }
 0x11f   :  { %1306 = vmatmul.msk.f32.vlgmr.msra.gmra.mxu3 %vm396_vm2, %v1304_v54  ;;  %v1324_v54 = vld [vmem:[%s1803_s6 + $0x8] sm:$0xff] }
 0x125   :  { %623 = vrot.lane.b32.xlu2 %v389_v52, %s1383_s2  ;;  %474 = vrot.lane.b32.xlu1 %v389_v52, %s1384_s18 }
 0x126   :  { %533 = vrot.lane.b32.xlu0 %v389_v52, %s1385_s19 }
 0x12d   :  { %75 = vperm.xlu2 %1368, %v72_v53   ;;  %593 = vrot.lane.b32.xlu1 %v389_v52, %s1386_s22 }
 0x12e   :  { %563 = vrot.lane.b32.xlu0 %v389_v52, %s1387_s23 }
 0x136   :  { %654 = vperm.xlu0 %1369, %v651_v58  }
 0x177   :  { %v446_v55 = vpop.permute.xlu2 %445 }
 0x178   :  { %v447_v56 = vmul.f32 %v1509_v11, %v446_v55  ;;  %v915_v55 = vld [vmem:[%s1804_s7] sm:$0xff] }
 0x17a   :  { %466 = vmatpush.msrb.mxu0 %v447_v56 }
 0x17b   :  { %1308 = vmatmul.msk.f32.vlgmr.msrb.gmra.mxu0 %vm396_vm2, %v1307_v57 }
 0x17f   :  { %v624_v62 = vpop.permute.xlu2 %623 }
 0x180   :  { %v626_v2 = vmul.f32 %v1594_v60, %v624_v62  ;;  %v662_v62 = vld [vmem:[%s1803_s6] sm:$0xff] }
 0x187   :  { %v76_v40 = vpop.permute.xlu2 %75 }
 0x188   :  { %v104_v45 = vadd.f32 %v1566_v32, %v76_v40  ;;  %v1178_v40 = vld [vmem:[%s1805_s9] sm:$0xff] }
 0x18f   :  { %v505_v59 = vpop.permute.xlu1 %504 }
 0x190   :  { %v394_v61 = vpop.permute.xlu0 %393  ;;  %v506_v63 = vmul.f32 %v1526_v18, %v505_v59  ;;  %v1334_v59 = vld [vmem:[%s1803_s6 + $0x38] sm:$0xff] }
 0x191   :  { %v395_v0 = vmul.f32 %v1504_v10, %v394_v61 }
 0x193   :  { %415 = vmatpush.msra.mxu2 %v395_v0 }
 0x194   :  { %1305 = vmatmul.msk.f32.vlgmr.msra.gmra.mxu2 %vm396_vm2, %v392_v1 }
 0x195   :  { %525 = vmatpush.msrb.mxu2 %v506_v63 }
 0x197   :  { %645 = vmatpush.msra.mxu2 %v626_v2  ;;  %v475_v5 = vpop.permute.xlu1 %474 }
 0x198   :  { %v477_v7 = vmul.f32 %v1606_v3, %v475_v5  ;;  %v534_v8 = vpop.permute.xlu0 %533  ;;  %v1332_v5 = vld [vmem:[%s1803_s6 + $0x30] sm:$0xff] }
 0x199   :  { %v536_v12 = vmul.f32 %v1611_v4, %v534_v8  ;;  %v1328_v8 = vld [vmem:[%s1803_s6 + $0x18] sm:$0xff] }
 0x19a   :  { %496 = vmatpush.msrb.mxu1 %v477_v7 }
 0x19b   :  { %555 = vmatpush.msrb.mxu3 %v536_v12  ;;  %1310 = vmatmul.msk.f32.vlgmr.msrb.gmra.mxu1 %vm396_vm2, %v1309_v9 }
 0x19c   :  { %1312 = vmatmul.msk.f32.vlgmr.msrb.gmra.mxu2 %vm396_vm2, %v1311_v13  ;;  %1314 = vmatmul.msk.f32.vlgmr.msrb.gmra.mxu3 %vm396_vm2, %v1313_v14  ;;  %v1330_v14 = vld [vmem:[%s1803_s6 + $0x28] sm:$0xff] }
 0x19f   :  { %v594_v17 = vpop.permute.xlu1 %593 }
 0x1a0   :  { %v596_v19 = vmul.f32 %v1630_v15, %v594_v17  ;;  %v564_v20 = vpop.permute.xlu0 %563  ;;  %v1336_v17 = vld [vmem:[%s1803_s6 + $0x40] sm:$0xff] }
 0x1a1   :  { %v566_v22 = vmul.f32 %v1635_v16, %v564_v20 }
 0x1a2   :  { %615 = vmatpush.msra.mxu1 %v596_v19  ;;  %v440_v25 = vpop.f32.mrf.mxu3 }
 0x1a3   :  { %585 = vmatpush.msra.mxu0 %v566_v22  ;;  %1318 = vmatmul.msk.f32.vlgmr.msra.gmra.mxu1 %vm396_vm2, %v1317_v21 }
 0x1a4   :  { %1320 = vmatmul.msk.f32.vlgmr.msra.gmra.mxu2 %vm396_vm2, %v1319_v23  ;;  %1316 = vmatmul.msk.f32.vlgmr.msra.gmra.mxu0 %vm396_vm2, %v1315_v24 }
 0x1a8   :  { %v655_v43 = vpop.permute.xlu0 %654 }
 0x1f8   :  { %v468_v27 = vpop.f32.mrf.mxu0 }
 0x217   :  { %v417_v26 = vpop.f32.mrf.mxu2 }
 0x218   :  { %v441_v28 = vadd.f32 %v440_v25, %v417_v26  ;;  %v498_v30 = vpop.f32.mrf.mxu1 }
 0x21a   :  { %v471_v29 = vadd.f32 %v468_v27, %v441_v28 }
 0x21c   :  { %v501_v31 = vadd.f32 %v498_v30, %v471_v29 }
 0x21f   :  { %v527_v33 = vpop.f32.mrf.mxu2  ;;  %v557_v34 = vpop.f32.mrf.mxu3 }
 0x220   :  { %v530_v35 = vadd.f32 %v527_v33, %v501_v31  ;;  %v617_v38 = vpop.f32.mrf.mxu1 }
 0x221   :  { %v587_v36 = vpop.f32.mrf.mxu0 }
 0x222   :  { %v560_v37 = vadd.f32 %v557_v34, %v530_v35 }
 0x224   :  { %v590_v39 = vadd.f32 %v587_v36, %v560_v37 }
 0x226   :  { %v620_v41 = vadd.f32 %v617_v38, %v590_v39 }
 0x227   :  { %v647_v42 = vpop.f32.mrf.mxu2 }
 0x228   :  { %v650_v44 = vadd.f32 %v647_v42, %v620_v41  ;;  %v1260_v41 = vld [vmem:[%s1806_s15] sm:$0xff] }
 0x229   :  { %v1338_v42 = vld [vmem:[%s1807_s8 + $0x20] sm:$0xff] }
 0x22a   :  { %v657_v46 = vadd.f32 %v655_v43, %v650_v44 }
 0x22c   :  { %v658_v47 = vadd.f32 %v657_v46, %v104_v45  ;;  %v1341_v45 = vld [vmem:[%s1807_s8 + $0x8] sm:$0xff] }
 0x22e   :  { %v1652_v48 = vmax.f32 %v658_v47, 0.0 }
 0x230   :  { %859 = vrot.lane.b32.xlu0 %v1652_v48, %s1386_s22  ;;  %743 = vrot.lane.b32.xlu2 %v1652_v48, %s1384_s18 }
 0x231   :  { %663 = vrot.lane.b32.xlu1 %v1652_v48, %s1379_s26  ;;  %707 = vmatpush.msrb.mxu0 %v1652_v48 }
 0x232   :  { %1323 = vmatmul.msk.f32.vlgmr.msrb.gmra.mxu0 %vm396_vm2, %v1321_v51 }
 0x238   :  { %830 = vrot.lane.b32.xlu0 %v1652_v48, %s1387_s23  ;;  %714 = vrot.lane.b32.xlu2 %v1652_v48, %s1380_s27 }
 0x239   :  { %772 = vrot.lane.b32.xlu1 %v1652_v48, %s1381_s28 }
 0x240   :  { %888 = vrot.lane.b32.xlu2 %v1652_v48, %s1383_s2 }
 0x241   :  { %801 = vrot.lane.b32.xlu1 %v1652_v48, %s1385_s19 }
 0x249   :  { %918 = vperm.xlu1 %1370, %v915_v55  }
 0x28a   :  { %v744_v32 = vpop.permute.xlu2 %743 }
 0x28b   :  { %v745_v49 = vmul.f32 %v1606_v3, %v744_v32  ;;  %v1349_v32 = vld [vmem:[%s1807_s8 + $0x30] sm:$0xff] }
 0x28d   :  { %764 = vmatpush.msrb.mxu2 %v745_v49 }
 0x28e   :  { %1327 = vmatmul.msk.f32.vlgmr.msrb.gmra.mxu2 %vm396_vm2, %v1326_v50  ;;  %v1347_v50 = vld [vmem:[%s1807_s8 + $0x28] sm:$0xff] }
 0x292   :  { %v715_v52 = vpop.permute.xlu2 %714 }
 0x293   :  { %v716_v53 = vmul.f32 %v1509_v11, %v715_v52 }
 0x295   :  { %735 = vmatpush.msrb.mxu1 %v716_v53 }
 0x296   :  { %1325 = vmatmul.msk.f32.vlgmr.msrb.gmra.mxu1 %vm396_vm2, %v1324_v54  ;;  %v925_v54 = vld [vmem:[%s1807_s8] sm:$0xff] }
 0x29a   :  { %v889_v0 = vpop.permute.xlu2 %888 }
 0x29b   :  { %v890_v9 = vmul.f32 %v1594_v60, %v889_v0 }
 0x2a2   :  { %v860_v56 = vpop.permute.xlu0 %859 }
 0x2a3   :  { %v861_v57 = vmul.f32 %v1630_v15, %v860_v56  ;;  %v664_v58 = vpop.permute.xlu1 %663 }
 0x2a4   :  { %v665_v61 = vmul.f32 %v1504_v10, %v664_v58  ;;  %v1351_v58 = vld [vmem:[%s1807_s8 + $0x38] sm:$0xff] }
 0x2a5   :  { %880 = vmatpush.msra.mxu2 %v861_v57  ;;  %v1345_v57 = vld [vmem:[%s1807_s8 + $0x18] sm:$0xff] }
 0x2a6   :  { %684 = vmatpush.msra.mxu3 %v665_v61  ;;  %1335 = vmatmul.msk.f32.vlgmr.msra.gmra.mxu2 %vm396_vm2, %v1334_v59  ;;  %v1353_v59 = vld [vmem:[%s1807_s8 + $0x40] sm:$0xff] }
 0x2a7   :  { %1322 = vmatmul.msk.f32.vlgmr.msra.gmra.mxu3 %vm396_vm2, %v662_v62  ;;  %v1235_v61 = vld [vmem:[%s1808_s14] sm:$0xff] }
 0x2a8   :  { %v1188_v62 = vld [vmem:[%s1809_s13] sm:$0xff] }
 0x2aa   :  { %v831_v63 = vpop.permute.xlu0 %830 }
 0x2ab   :  { %v832_v1 = vmul.f32 %v1635_v16, %v831_v63  ;;  %v773_v2 = vpop.permute.xlu1 %772 }
 0x2ac   :  { %v774_v7 = vmul.f32 %v1526_v18, %v773_v2 }
 0x2ad   :  { %851 = vmatpush.msra.mxu1 %v832_v1 }
 0x2ae   :  { %793 = vmatpush.msrb.mxu3 %v774_v7  ;;  %1333 = vmatmul.msk.f32.vlgmr.msra.gmra.mxu1 %vm396_vm2, %v1332_v5 }
 0x2af   :  { %1329 = vmatmul.msk.f32.vlgmr.msrb.gmra.mxu3 %vm396_vm2, %v1328_v8  ;;  %v709_v19 = vpop.f32.mrf.mxu0 }
 0x2b0   :  { %909 = vmatpush.msra.mxu3 %v890_v9 }
 0x2b3   :  { %v802_v12 = vpop.permute.xlu1 %801 }
 0x2b4   :  { %v803_v13 = vmul.f32 %v1611_v4, %v802_v12 }
 0x2b6   :  { %822 = vmatpush.msra.mxu0 %v803_v13 }
 0x2b7   :  { %1331 = vmatmul.msk.f32.vlgmr.msra.gmra.mxu0 %vm396_vm2, %v1330_v14  ;;  %1337 = vmatmul.msk.f32.vlgmr.msra.gmra.mxu3 %vm396_vm2, %v1336_v17 }
 0x2bb   :  { %v919_v36 = vpop.permute.xlu1 %918 }
 0x311   :  { %v766_v24 = vpop.f32.mrf.mxu2 }
 0x313   :  { %v737_v21 = vpop.f32.mrf.mxu1 }
 0x329   :  { %v882_v31 = vpop.f32.mrf.mxu2 }
 0x32a   :  { %v686_v20 = vpop.f32.mrf.mxu3 }
 0x32b   :  { %v710_v22 = vadd.f32 %v709_v19, %v686_v20  ;;  %v853_v29 = vpop.f32.mrf.mxu1 }
 0x32d   :  { %v740_v23 = vadd.f32 %v737_v21, %v710_v22 }
 0x32f   :  { %v769_v25 = vadd.f32 %v766_v24, %v740_v23 }
 0x332   :  { %v795_v26 = vpop.f32.mrf.mxu3 }
 0x333   :  { %v798_v27 = vadd.f32 %v795_v26, %v769_v25  ;;  %v1187_v26 = vld [vmem:[%s1810_s12] sm:$0xff] }
 0x334   :  { %v824_v28 = vpop.f32.mrf.mxu0 }
 0x335   :  { %v827_v30 = vadd.f32 %v824_v28, %v798_v27 }
 0x337   :  { %v856_v33 = vadd.f32 %v853_v29, %v827_v30 }
 0x339   :  { %v885_v34 = vadd.f32 %v882_v31, %v856_v33 }
 0x33a   :  { %v911_v35 = vpop.f32.mrf.mxu3 }
 0x33b   :  { %v914_v37 = vadd.f32 %v911_v35, %v885_v34 }
 0x33d   :  { %v921_v38 = vadd.f32 %v919_v36, %v914_v37 }
 0x33f   :  { %v922_v39 = vmax.f32 %v921_v38, 0.0 }
 0x341   :  { %1006 = vrot.lane.b32.xlu1 %v922_v39, %s1384_s18  ;;  %926 = vrot.lane.b32.xlu0 %v922_v39, %s1379_s26 }
 0x342   :  { %977 = vrot.lane.b32.xlu2 %v922_v39, %s1380_s27  ;;  %970 = vmatpush.msrb.mxu1 %v922_v39 }
 0x343   :  { %1340 = vmatmul.msk.f32.vlgmr.msrb.gmra.mxu1 %vm396_vm2, %v1338_v42 }
 0x349   :  { %1122 = vrot.lane.b32.xlu1 %v922_v39, %s1386_s22  ;;  %1035 = vrot.lane.b32.xlu0 %v922_v39, %s1381_s28 }
 0x34a   :  { %1093 = vrot.lane.b32.xlu2 %v922_v39, %s1387_s23 }
 0x351   :  { %1181 = vperm.xlu1 %1370, %v1178_v40   ;;  %1151 = vrot.lane.b32.xlu0 %v922_v39, %s1383_s2 }
 0x352   :  { %1064 = vrot.lane.b32.xlu2 %v922_v39, %s1385_s19 }
 0x35a   :  { %1263 = vperm.xlu2 %1368, %v1260_v41  }
 0x39c   :  { %v978_v43 = vpop.permute.xlu2 %977 }
 0x39d   :  { %v979_v44 = vmul.f32 %v1509_v11, %v978_v43 }
 0x39f   :  { %998 = vmatpush.msrb.mxu2 %v979_v44 }
 0x3a0   :  { %1342 = vmatmul.msk.f32.vlgmr.msrb.gmra.mxu2 %vm396_vm2, %v1341_v45 }
 0x3a4   :  { %v1094_v46 = vpop.permute.xlu2 %1093 }
 0x3a5   :  { %v1095_v47 = vmul.f32 %v1635_v16, %v1094_v46 }
 0x3a7   :  { %1114 = vmatpush.msra.mxu2 %v1095_v47 }
 0x3a8   :  { %1350 = vmatmul.msk.f32.vlgmr.msra.gmra.mxu2 %vm396_vm2, %v1349_v32 }
 0x3ac   :  { %v1065_v49 = vpop.permute.xlu2 %1064 }
 0x3ad   :  { %v1066_v11 = vmul.f32 %v1611_v4, %v1065_v49  ;;  %v1343_v4 = vld [vmem:[%s1807_s8 + $0x10] sm:$0xff] }
 0x3af   :  { %1085 = vmatpush.msra.mxu1 %v1066_v11 }
 0x3b0   :  { %1348 = vmatmul.msk.f32.vlgmr.msra.gmra.mxu1 %vm396_vm2, %v1347_v50 }
 0x3b1   :  { %1207 = vmatpush.msrb.mxu1 %v1652_v48 }
 0x3b3   :  { %v1007_v16 = vpop.permute.xlu1 %1006  ;;  %v927_v51 = vpop.permute.xlu0 %926 }
 0x3b4   :  { %v1008_v52 = vmul.f32 %v1606_v3, %v1007_v16  ;;  %v928_v53 = vmul.f32 %v1504_v10, %v927_v51  ;;  %v1264_v33 = vpop.permute.xlu2 %1263 }
 0x3b6   :  { %947 = vmatpush.msrb.mxu0 %v928_v53  ;;  %1027 = vmatpush.msrb.mxu3 %v1008_v52 }
 0x3b7   :  { %1339 = vmatmul.msk.f32.vlgmr.msrb.gmra.mxu0 %vm396_vm2, %v925_v54  ;;  %1344 = vmatmul.msk.f32.vlgmr.msrb.gmra.mxu3 %vm396_vm2, %v1343_v4 }
 0x3b8   :  { %1355 = vmatmul.msk.f32.vlgmr.msrb.gmra.mxu1 %vm396_vm2, %v1188_v62 }
 0x3bb   :  { %v1123_v55 = vpop.permute.xlu1 %1122  ;;  %v1036_v56 = vpop.permute.xlu0 %1035 }
 0x3bc   :  { %v1124_v3 = vmul.f32 %v1630_v15, %v1123_v55  ;;  %v1037_v10 = vmul.f32 %v1526_v18, %v1036_v56 }
 0x3be   :  { %1056 = vmatpush.msra.mxu0 %v1037_v10  ;;  %1143 = vmatpush.msra.mxu3 %v1124_v3 }
 0x3bf   :  { %1346 = vmatmul.msk.f32.vlgmr.msra.gmra.mxu0 %vm396_vm2, %v1345_v57  ;;  %1352 = vmatmul.msk.f32.vlgmr.msra.gmra.mxu3 %vm396_vm2, %v1351_v58 }
 0x3c0   :  { %1357 = vmatpush.msk.msrb.mxu3 %vm82_vm0, %v1490_v6  ;;  %v972_v6 = vpop.f32.mrf.mxu1 }
 0x3c3   :  { %v1152_v15 = vpop.permute.xlu0 %1151  ;;  %v1182_v22 = vpop.permute.xlu1 %1181 }
 0x3c4   :  { %v1153_v18 = vmul.f32 %v1594_v60, %v1152_v15 }
 0x3c6   :  { %1172 = vmatpush.msrb.mxu0 %v1153_v18 }
 0x3c7   :  { %1354 = vmatmul.msk.f32.vlgmr.msrb.gmra.mxu0 %vm396_vm2, %v1353_v59  ;;  %1358 = vmatmul.msk.f32.vlgmr.msrb.gmra.mxu3 %vm78_vm1, %v1235_v61 }
 0x423   :  { %v1000_v0 = vpop.f32.mrf.mxu2 }
 0x42b   :  { %v1116_v12 = vpop.f32.mrf.mxu2 }
 0x42d   :  { %v1087_v8 = vpop.f32.mrf.mxu1 }
 0x434   :  { %v949_v60 = vpop.f32.mrf.mxu0 }
 0x435   :  { %v973_v63 = vadd.f32 %v972_v6, %v949_v60  ;;  %v1209_v27 = vpop.f32.mrf.mxu1 }
 0x437   :  { %v1003_v1 = vadd.f32 %v1000_v0, %v973_v63 }
 0x43a   :  { %v1029_v2 = vpop.f32.mrf.mxu3 }
 0x43b   :  { %v1032_v5 = vadd.f32 %v1029_v2, %v1003_v1 }
 0x43c   :  { %v1058_v7 = vpop.f32.mrf.mxu0 }
 0x43d   :  { %v1061_v9 = vadd.f32 %v1058_v7, %v1032_v5 }
 0x43f   :  { %v1090_v13 = vadd.f32 %v1087_v8, %v1061_v9 }
 0x441   :  { %v1119_v14 = vadd.f32 %v1116_v12, %v1090_v13 }
 0x442   :  { %v1145_v17 = vpop.f32.mrf.mxu3 }
 0x443   :  { %v1148_v19 = vadd.f32 %v1145_v17, %v1119_v14 }
 0x444   :  { %v1174_v20 = vpop.f32.mrf.mxu0 }
 0x445   :  { %v1177_v21 = vadd.f32 %v1174_v20, %v1148_v19 }
 0x447   :  { %v1184_v23 = vadd.f32 %v1182_v22, %v1177_v21 }
 0x449   :  { %v1185_v24 = vadd.f32 %v1184_v23, %v1652_v48 }
 0x44a   :  { %v1256_v29 = vpop.f32.mrf.mxu3 }
 0x44b   :  { %v1186_v25 = vmax.f32 %v1185_v24, 0.0 }
 0x44d   :  { %1230 = vmatpush.msrb.mxu2 %v1186_v25 }
 0x44e   :  { %1356 = vmatmul.msk.f32.vlgmr.msrb.gmra.mxu2 %vm396_vm2, %v1187_v26 }
 0x4d1   :  { %v1232_v28 = vpop.f32.mrf.mxu2 }
 0x4d2   :  { %v1233_v30 = vadd.f32 %v1232_v28, %v1209_v27 }
 0x4d4   :  { %v1259_v31 = vadd.f32 %v1256_v29, %v1233_v30 }
 0x4d6   :  { %v1266_v34 = vadd.f32 %v1264_v33, %v1259_v31 }
 0x4d8   :  { %v1267_v35 = vmax.f32 %v1266_v34, 0.0 }
 0x4da   :  { %1268 = vst [vmem:[%s1811_s16] sm:$0xff] %v1267_v35 }

</bundles_post_ra>
